<compile_context>
chip_gen: v5e
topology: v5e:2x2
jax: 0.10.0
libtpu: 0.0.40
codegen_flags: <defaults>
</compile_context>

<pallas_src>
import functools
import math

import jax
import jax.numpy as jnp
from jax.experimental import pallas as pl
from jax.experimental.pallas import tpu as pltpu


def _round_up(x, m):
    return ((x + m - 1) // m) * m


def _gelu(h_f32, approximate):
    """GELU on an f32 tile. approximate=False matches torch.nn.GELU() (erf)."""
    if approximate:
        # tanh approximation: the tanh goes to the EUP slot (free w.r.t. VALU).
        c = jnp.float32(math.sqrt(2.0 / math.pi))
        a = jnp.float32(0.044715)
        return 0.5 * h_f32 * (1.0 + jnp.tanh(c * (h_f32 + a * h_f32 * h_f32 * h_f32)))
    inv_sqrt2 = jnp.float32(1.0 / math.sqrt(2.0))
    return 0.5 * h_f32 * (1.0 + jax.lax.erf(h_f32 * inv_sqrt2))


# --------------------------------------------------------------------------
# Schedule 1: weights resident in VMEM (grid over row tiles only).
# --------------------------------------------------------------------------
def _mlp_kernel_resident(x_ref, w1_ref, b1_ref, w2_ref, b2_ref, o_ref,
                         *, approximate_gelu):
    h = jnp.dot(x_ref[...], w1_ref[...], preferred_element_type=jnp.float32)
    h = h + b1_ref[...].astype(jnp.float32)
    h = _gelu(h, approximate_gelu)
    # (Dropout: identity in eval mode.)
    out = jnp.dot(h.astype(w2_ref.dtype), w2_ref[...],
                  preferred_element_type=jnp.float32)
    out = out + b2_ref[...].astype(jnp.float32)
    # (Dropout: identity in eval mode.)
    o_ref[...] = out.astype(o_ref.dtype)


# --------------------------------------------------------------------------
# Schedule 2: mlp_dim reduction axis + f32 accumulator (weights streamed).
# --------------------------------------------------------------------------
def _mlp_kernel_reduce(x_ref, w1_ref, b1_ref, w2_ref, b2_ref, o_ref, acc_ref,
                       *, approximate_gelu):
    k = pl.program_id(1)

    @pl.when(k == 0)
    def _init():
        acc_ref[...] = jnp.zeros_like(acc_ref)

    h = jnp.dot(x_ref[...], w1_ref[...], preferred_element_type=jnp.float32)
    h = h + b1_ref[...].astype(jnp.float32)
    h = _gelu(h, approximate_gelu)
    # (Dropout: identity in eval mode.)
    acc_ref[...] += jnp.dot(h.astype(w2_ref.dtype), w2_ref[...],
                            preferred_element_type=jnp.float32)

    @pl.when(k == pl.num_programs(1) - 1)
    def _finalize():
        out = acc_ref[...] + b2_ref[...].astype(jnp.float32)
        # (Dropout: identity in eval mode.)
        o_ref[...] = out.astype(o_ref.dtype)


# --------------------------------------------------------------------------
# VMEM sizing helpers (conservative: all pipelined buffers counted x2).
# --------------------------------------------------------------------------
def _resident_vmem_bytes(tile_n, e_pad, m_pad, itemsize):
    weights = 2 * (2 * e_pad * m_pad + m_pad + e_pad) * itemsize   # W1,W2,b1,b2
    io = 2 * 2 * tile_n * e_pad * itemsize                         # x tile + out tile
    hidden = 2 * tile_n * m_pad * 4                                # f32 hidden temporaries
    return weights + io + hidden


def _reduce_vmem_bytes(tile_n, tile_m, e_pad, itemsize):
    weights = 2 * (2 * e_pad * tile_m + tile_m + e_pad) * itemsize
    io = 2 * 2 * tile_n * e_pad * itemsize
    acc = tile_n * e_pad * 4
    hidden = 2 * tile_n * tile_m * 4
    return weights + io + acc + hidden


def mlp_block(x, w1, b1, w2, b2, *, row_tile=1024, m_tile=512,
              vmem_budget_bytes=48 * 1024 * 1024,
              approximate_gelu=False, force_path=None):
    """x: (B, S, E). w1: (E, M), b1: (M,), w2: (M, E), b2: (E,). Returns (B, S, E).

    force_path: None (auto), "resident", or "reduce".
    Pass bf16 x/w1/w2 for full MXU throughput; f32 accumulation is always used.
    """
    B, S, E = x.shape
    M = w1.shape[1]
    N = B * S
    out_dtype = x.dtype
    itemsize = jnp.dtype(x.dtype).itemsize

    E_pad = _round_up(E, 128)
    M_pad128 = _round_up(M, 128)

    # ---- row tile selection -------------------------------------------------
    n_ceil = _round_up(N, 128)
    tile_n = min(_round_up(row_tile, 128), n_ceil)
    # Keep >= 2 row tiles when possible so v7x's two TensorCores both get work.
    if tile_n == n_ceil and n_ceil >= 256:
        tile_n = _round_up(-(-N // 2), 128)

    # ---- try the weight-resident schedule ------------------------------------
    tn_res = tile_n
    while tn_res > 128 and _resident_vmem_bytes(tn_res, E_pad, M_pad128,
                                                itemsize) > vmem_budget_bytes:
        tn_res -= 128
    resident_fits = _resident_vmem_bytes(tn_res, E_pad, M_pad128,
                                         itemsize) <= vmem_budget_bytes
    use_resident = (force_path != "reduce") and (force_path == "resident"
                                                 or resident_fits)

    if use_resident:
        tile_n = tn_res
        tile_m = M_pad128          # full M resident
        M_pad = M_pad128
    else:
        # ---- streamed-weights fallback: shrink tiles until they fit ----------
        tile_m = min(_round_up(m_tile, 128), M_pad128)
        tn = tile_n
        while (_reduce_vmem_bytes(tn, tile_m, E_pad, itemsize) > vmem_budget_bytes
               and (tn > 128 or tile_m > 128)):
            if tile_m >= tn and tile_m > 128:
                tile_m -= 128
            elif tn > 128:
                tn -= 128
            else:
                tile_m -= 128
        tile_n = tn
        M_pad = _round_up(M, tile_m)

    N_pad = _round_up(N, tile_n)

    # ---- padding (skipped entirely when dims are already 128-aligned) --------
    x2 = x.reshape(N, E)
    if (N_pad, E_pad) != (N, E):
        x2 = jnp.pad(x2, ((0, N_pad - N), (0, E_pad - E)))
    # TODO(synk): for non-128-aligned E/M, pre-pad the weights once at init
    # time instead of per call (no-op for ViT's 768/3072).
    w1p = w1 if (E_pad, M_pad) == (E, M) else jnp.pad(
        w1, ((0, E_pad - E), (0, M_pad - M)))
    b1p = (b1 if M_pad == M else jnp.pad(b1, (0, M_pad - M))).reshape(1, M_pad)
    w2p = w2 if (M_pad, E_pad) == (M, E) else jnp.pad(
        w2, ((0, M_pad - M), (0, E_pad - E)))
    b2p = (b2 if E_pad == E else jnp.pad(b2, (0, E_pad - E))).reshape(1, E_pad)

    vmem_limit = int(min(vmem_budget_bytes + (4 << 20), 56 << 20))
    n_row_tiles = N_pad // tile_n

    if use_resident:
        cost = pl.CostEstimate(
            flops=4 * N_pad * E_pad * M_pad,
            transcendentals=N_pad * M_pad,
            bytes_accessed=(x2.size + w1p.size + b1p.size + w2p.size + b2p.size
                            + N_pad * E_pad) * itemsize,
        )
        out2 = pl.pallas_call(
            functools.partial(_mlp_kernel_resident,
                              approximate_gelu=approximate_gelu),
            out_shape=jax.ShapeDtypeStruct((N_pad, E_pad), out_dtype),
            grid_spec=pltpu.PrefetchScalarGridSpec(
                num_scalar_prefetch=0,
                grid=(n_row_tiles,),
                in_specs=[
                    pl.BlockSpec((tile_n, E_pad), lambda i: (i, 0)),   # x rows
                    pl.BlockSpec((E_pad, M_pad), lambda i: (0, 0)),    # W1 (resident)
                    pl.BlockSpec((1, M_pad), lambda i: (0, 0)),        # b1 (resident)
                    pl.BlockSpec((M_pad, E_pad), lambda i: (0, 0)),    # W2 (resident)
                    pl.BlockSpec((1, E_pad), lambda i: (0, 0)),        # b2 (resident)
                ],
                out_specs=pl.BlockSpec((tile_n, E_pad), lambda i: (i, 0)),
            ),
            compiler_params=pltpu.CompilerParams(
                dimension_semantics=("parallel",),
                vmem_limit_bytes=vmem_limit),
            cost_estimate=cost,
        )(x2, w1p, b1p, w2p, b2p)
    else:
        cost = pl.CostEstimate(
            flops=4 * N_pad * E_pad * M_pad,
            transcendentals=N_pad * M_pad,
            # Weights are re-streamed once per row tile in this schedule.
            bytes_accessed=(x2.size + N_pad * E_pad
                            + n_row_tiles * (w1p.size + b1p.size
                                             + w2p.size + b2p.size)) * itemsize,
        )
        out2 = pl.pallas_call(
            functools.partial(_mlp_kernel_reduce,
                              approximate_gelu=approximate_gelu),
            out_shape=jax.ShapeDtypeStruct((N_pad, E_pad), out_dtype),
            grid_spec=pltpu.PrefetchScalarGridSpec(
                num_scalar_prefetch=0,
                grid=(n_row_tiles, M_pad // tile_m),
                in_specs=[
                    pl.BlockSpec((tile_n, E_pad), lambda i, k: (i, 0)),   # x rows
                    pl.BlockSpec((E_pad, tile_m), lambda i, k: (0, k)),   # W1 slice
                    pl.BlockSpec((1, tile_m), lambda i, k: (0, k)),       # b1 slice
                    pl.BlockSpec((tile_m, E_pad), lambda i, k: (k, 0)),   # W2 slice
                    pl.BlockSpec((1, E_pad), lambda i, k: (0, 0)),        # b2
                ],
                out_specs=pl.BlockSpec((tile_n, E_pad), lambda i, k: (i, 0)),
                scratch_shapes=[pltpu.VMEM((tile_n, E_pad), jnp.float32)],
            ),
            compiler_params=pltpu.CompilerParams(
                dimension_semantics=("parallel", "arbitrary"),
                vmem_limit_bytes=vmem_limit),
            cost_estimate=cost,
        )(x2, w1p, b1p, w2p, b2p)

    return out2[:N, :E].reshape(B, S, E)


def init_params(key, embed_dim, mlp_dim, dtype=jnp.float32):
    """Deterministic init mimicking nn.Linear default (uniform ±1/sqrt(fan_in))."""
    k1, k2, k3, k4 = jax.random.split(key, 4)
    lim1 = 1.0 / math.sqrt(embed_dim)
    lim2 = 1.0 / math.sqrt(mlp_dim)
    w1 = jax.random.uniform(k1, (embed_dim, mlp_dim), dtype, -lim1, lim1)
    b1 = jax.random.uniform(k2, (mlp_dim,), dtype, -lim1, lim1)
    w2 = jax.random.uniform(k3, (mlp_dim, embed_dim), dtype, -lim2, lim2)
    b2 = jax.random.uniform(k4, (embed_dim,), dtype, -lim2, lim2)
    return w1, b1, w2, b2


if __name__ == "__main__":
    B, S, E, M = 2, 8, 32, 64  # batch, seq, embed_dim, mlp_dim

    key = jax.random.PRNGKey(0)
    kx, kp = jax.random.split(key)
    x = jax.random.normal(kx, (B, S, E), jnp.float32)
    w1, b1, w2, b2 = init_params(kp, E, M)

    # Pure-JAX reference (eval-mode dropout == identity, exact-erf GELU).
    ref = jax.nn.gelu(x @ w1 + b1, approximate=False) @ w2 + b2

    # Default (auto -> weight-resident schedule at these sizes).
    out = jax.block_until_ready(mlp_block(x, w1, b1, w2, b2))
    assert out.shape == (B, S, E)
    assert jnp.allclose(out, ref, atol=1e-5, rtol=1e-5), "resident path mismatch"

    # Streamed-weights fallback schedule (forced) must match too.
    out_r = jax.block_until_ready(mlp_block(x, w1, b1, w2, b2, force_path="reduce"))
    assert jnp.allclose(out_r, ref, atol=1e-5, rtol=1e-5), "reduce path mismatch"

    # Optional tanh-approx GELU (EUP path) — small approximation error vs erf.
    out_a = jax.block_until_ready(mlp_block(x, w1, b1, w2, b2, approximate_gelu=True))
    assert jnp.allclose(out_a, ref, atol=3e-2, rtol=0), "approx-gelu path mismatch"

    print("KERNEL_OK")
</pallas_src>

<mosaic_0001>
module attributes {stable_mosaic.version = 11 : i64} {
  func.func @_mlp_kernel_resident(%arg0: i32, %arg1: memref<128x128xf32, #tpu.memory_space<vmem>>, %arg2: memref<128x128xf32, #tpu.memory_space<vmem>>, %arg3: memref<1x128xf32, #tpu.memory_space<vmem>>, %arg4: memref<128x128xf32, #tpu.memory_space<vmem>>, %arg5: memref<1x128xf32, #tpu.memory_space<vmem>>, %arg6: memref<128x128xf32, #tpu.memory_space<vmem>>) attributes {dimension_semantics = [#tpu.dimension_semantics<parallel>], iteration_bounds = array<i64: 1>, scalar_prefetch = 0 : i64, scratch_operands = 0 : i64, tpu.core_type = #tpu.core_type<tc>, window_params = [{transform_indices = @transform_0, window_bounds = array<i64: 128, 128>}, {pipeline_mode = #tpu.pipeline_mode<synchronous>, transform_indices = @transform_1, window_bounds = array<i64: 128, 128>}, {pipeline_mode = #tpu.pipeline_mode<synchronous>, transform_indices = @transform_2, window_bounds = array<i64: 1, 128>}, {pipeline_mode = #tpu.pipeline_mode<synchronous>, transform_indices = @transform_3, window_bounds = array<i64: 128, 128>}, {pipeline_mode = #tpu.pipeline_mode<synchronous>, transform_indices = @transform_4, window_bounds = array<i64: 1, 128>}, {transform_indices = @transform_5, window_bounds = array<i64: 128, 128>}]} {
    %c0 = arith.constant 0 : index
    %c0_0 = arith.constant 0 : index
    %0 = vector.load %arg1[%c0, %c0_0] : memref<128x128xf32, #tpu.memory_space<vmem>>, vector<128x128xf32>
    %c0_1 = arith.constant 0 : index
    %c0_2 = arith.constant 0 : index
    %1 = vector.load %arg2[%c0_1, %c0_2] : memref<128x128xf32, #tpu.memory_space<vmem>>, vector<128x128xf32>
    %cst = arith.constant dense<0.000000e+00> : vector<128x128xf32>
    %2 = tpu.matmul %0, %1, %cst {dimension_numbers = #tpu.dot_dimension_numbers<[1], [0], [0], [1], [0, 0, 1, 1], [], []>} : vector<128x128xf32>, vector<128x128xf32>, vector<128x128xf32> -> vector<128x128xf32>
    %c0_3 = arith.constant 0 : index
    %c0_4 = arith.constant 0 : index
    %3 = vector.load %arg3[%c0_3, %c0_4] : memref<1x128xf32, #tpu.memory_space<vmem>>, vector<1x128xf32>
    %4 = vector.broadcast %3 : vector<1x128xf32> to vector<128x128xf32>
    %5 = arith.addf %2, %4 : vector<128x128xf32>
    %cst_5 = arith.constant 5.000000e-01 : f32
    %6 = vector.broadcast %cst_5 : f32 to vector<128x128xf32>
    %7 = arith.mulf %6, %5 : vector<128x128xf32>
    %cst_6 = arith.constant 0.707106769 : f32
    %8 = vector.broadcast %cst_6 : f32 to vector<128x128xf32>
    %9 = arith.mulf %5, %8 : vector<128x128xf32>
    %10 = math.erf %9 : vector<128x128xf32>
    %cst_7 = arith.constant 1.000000e+00 : f32
    %11 = vector.broadcast %cst_7 : f32 to vector<128x128xf32>
    %12 = arith.addf %11, %10 : vector<128x128xf32>
    %13 = arith.mulf %7, %12 : vector<128x128xf32>
    %c0_8 = arith.constant 0 : index
    %c0_9 = arith.constant 0 : index
    %14 = vector.load %arg4[%c0_8, %c0_9] : memref<128x128xf32, #tpu.memory_space<vmem>>, vector<128x128xf32>
    %cst_10 = arith.constant dense<0.000000e+00> : vector<128x128xf32>
    %15 = tpu.matmul %13, %14, %cst_10 {dimension_numbers = #tpu.dot_dimension_numbers<[1], [0], [0], [1], [0, 0, 1, 1], [], []>} : vector<128x128xf32>, vector<128x128xf32>, vector<128x128xf32> -> vector<128x128xf32>
    %c0_11 = arith.constant 0 : index
    %c0_12 = arith.constant 0 : index
    %16 = vector.load %arg5[%c0_11, %c0_12] : memref<1x128xf32, #tpu.memory_space<vmem>>, vector<1x128xf32>
    %17 = vector.broadcast %16 : vector<1x128xf32> to vector<128x128xf32>
    %18 = arith.addf %15, %17 : vector<128x128xf32>
    %c0_13 = arith.constant 0 : index
    %c0_14 = arith.constant 0 : index
    %19 = vector.load %arg6[%c0_13, %c0_14] : memref<128x128xf32, #tpu.memory_space<vmem>>, vector<128x128xf32>
    tpu.vector_store %arg6[%c0_13, %c0_14], %18 {strides = array<i32>} : memref<128x128xf32, #tpu.memory_space<vmem>>, vector<128x128xf32>,
    return
  }
  func.func @transform_0(%arg0: i32) -> (i32, i32) {
    %c0_i32 = arith.constant 0 : i32
    %c0_i32_0 = arith.constant 0 : i32
    return %arg0, %c0_i32 : i32, i32
  }
  func.func @transform_1(%arg0: i32) -> (i32, i32) {
    %c0_i32 = arith.constant 0 : i32
    %c0_i32_0 = arith.constant 0 : i32
    %c0_i32_1 = arith.constant 0 : i32
    return %c0_i32, %c0_i32_0 : i32, i32
  }
  func.func @transform_2(%arg0: i32) -> (i32, i32) {
    %c0_i32 = arith.constant 0 : i32
    %c0_i32_0 = arith.constant 0 : i32
    %c0_i32_1 = arith.constant 0 : i32
    return %c0_i32, %c0_i32_0 : i32, i32
  }
  func.func @transform_3(%arg0: i32) -> (i32, i32) {
    %c0_i32 = arith.constant 0 : i32
    %c0_i32_0 = arith.constant 0 : i32
    %c0_i32_1 = arith.constant 0 : i32
    return %c0_i32, %c0_i32_0 : i32, i32
  }
  func.func @transform_4(%arg0: i32) -> (i32, i32) {
    %c0_i32 = arith.constant 0 : i32
    %c0_i32_0 = arith.constant 0 : i32
    %c0_i32_1 = arith.constant 0 : i32
    return %c0_i32, %c0_i32_0 : i32, i32
  }
  func.func @transform_5(%arg0: i32) -> (i32, i32) {
    %c0_i32 = arith.constant 0 : i32
    %c0_i32_0 = arith.constant 0 : i32
    return %arg0, %c0_i32 : i32, i32
  }
}

</mosaic_0001>

<bundles_post_ra>
// kernel: tpu_custom_call.1
= control target key start
LH: loop header
LB: loop body
LE: loop exit
PB: predicated region body
PF: predicated region fallthrough
CT: control target
= control target key end

     0   :  { %10 = vsyncpa [#allocation3], 0  ;;  %s1892_s0 = inlined_call_operand.hbm [shape: f32[128,128], index: 0, kind: input, shape index: {}]   ;;  %s1893_s1 = inlined_call_operand.hbm [shape: f32[128,128], index: 1, kind: input, shape index: {}]   ;;  %s1894_s2 = inlined_call_operand.vmem [shape: f32[1,128], index: 2, kind: input, shape index: {}]   ;;  %s1895_s3 = inlined_call_operand.hbm [shape: f32[128,128], index: 3, kind: input, shape index: {}]   ;;  %s1896_s4 = inlined_call_operand.vmem [shape: f32[1,128], index: 4, kind: input, shape index: {}]   ;;  %s1897_s5 = inlined_call_operand.hbm [shape: f32[128,128], index: 5, kind: output, shape index: {}]  }
   0x1   :  { %11 = vsyncpa [#allocation6], 0 }
   0x2   :  { %12 = vsyncpa [#allocation4], 0  ;;  %s30_s20 = sshll.u32 %s1893_s1, 4  ;;  %s1184_s21 = smov [#allocation5]   ;;  %s31_s20 = int_to_ptr.hbm [resolvable:$true] %s30_s20 }
   0x3   :  { %s32_s22 = sshll.u32 %s1184_s21, 4  ;;  %s17_s25 = sshll.u32 %s1892_s0, 4  ;;  %s33_s22 = int_to_ptr.vmem [resolvable:$true] %s32_s22  ;;  %s18_s25 = int_to_ptr.hbm [resolvable:$true] %s17_s25 }
   0x4   :  { %s1185_s26 = smov 128   ;;  %s1186_s27 = smov 8  }
   0x5   :  { %38 = dma.hbm_to_vmem [thread:$0]  %s31_s20, 2048, %s33_s22, [#allocation6], %s1185_s26, %s1185_s26, %s1186_s27  }
   0x6   :  { %s1187_s28 = smov [#allocation2]   ;;  %s45_s1 = sshll.u32 %s1895_s3, 4  ;;  %s46_s1 = int_to_ptr.hbm [resolvable:$true] %s45_s1 }
   0x7   :  { %s19_s29 = sshll.u32 %s1187_s28, 4  ;;  %s1188_s0 = smov [#allocation7]   ;;  %s20_s29 = int_to_ptr.vmem [resolvable:$true] %s19_s29 }
   0x8   :  { %25 = dma.hbm_to_vmem [thread:$0]  %s18_s25, 2048, %s20_s29, [#allocation3], %s1185_s26, %s1185_s26, %s1186_s27  }
   0x9   :  { %s47_s7 = sshll.u32 %s1188_s0, 4  ;;  %s48_s7 = int_to_ptr.vmem [resolvable:$true] %s47_s7 }
   0xa   :  { %53 = dma.hbm_to_vmem [thread:$0]  %s46_s1, 2048, %s48_s7, [#allocation6], %s1185_s26, %s1185_s26, %s1186_s27  }
   0xb   :  { %1178 = dma.done.wait [#allocation3], 2048  }
   0xc   :  { %1179 = vsyncadd [#allocation3], 4294965248 }
   0xd   :  { %1180 = dma.done.wait [#allocation6], 4096  }
   0xe   :  { %1181 = vsyncadd [#allocation6], 4294963200  ;;  %v99_v0 = vld [vmem:[#allocation5 + $0x78] sm:$0xff]  ;;  %v98_v1 = vld [vmem:[#allocation5 + $0x70] sm:$0xff]  ;;  %s980_s13 = sshll.u32 %s1897_s5, 4  ;;  %s981_s13 = int_to_ptr.hbm [resolvable:$true] %s980_s13 }
   0xf   :  { %104 = vmatpush.msra.mxu0 %v99_v0  ;;  %1010 = vmatpush.msra.mxu2 %v99_v0  ;;  %v97_v2 = vld [vmem:[#allocation5 + $0x68] sm:$0xff]  ;;  %v96_v3 = vld [vmem:[#allocation5 + $0x60] sm:$0xff]  ;;  %v95_v4 = vld [vmem:[#allocation5 + $0x58] sm:$0xff] }
  0x10   :  { %v94_v5 = vld [vmem:[#allocation5 + $0x50] sm:$0xff]  ;;  %v93_v6 = vld [vmem:[#allocation5 + $0x48] sm:$0xff]  ;;  %v92_v7 = vld [vmem:[#allocation5 + $0x40] sm:$0xff] }
  0x11   :  { %105 = vmatpush.msra.mxu0 %v98_v1  ;;  %1011 = vmatpush.msra.mxu2 %v98_v1  ;;  %v91_v8 = vld [vmem:[#allocation5 + $0x38] sm:$0xff]  ;;  %v90_v9 = vld [vmem:[#allocation5 + $0x30] sm:$0xff]  ;;  %v89_v10 = vld [vmem:[#allocation5 + $0x28] sm:$0xff] }
  0x12   :  { %v88_v11 = vld [vmem:[#allocation5 + $0x20] sm:$0xff]  ;;  %v87_v12 = vld [vmem:[#allocation5 + $0x18] sm:$0xff]  ;;  %v86_v13 = vld [vmem:[#allocation5 + $0x10] sm:$0xff] }
  0x13   :  { %106 = vmatpush.msra.mxu0 %v97_v2  ;;  %1012 = vmatpush.msra.mxu2 %v97_v2  ;;  %v85_v14 = vld [vmem:[#allocation5 + $0x8] sm:$0xff]  ;;  %v84_v15 = vld [vmem:[#allocation5] sm:$0xff]  ;;  %v70_v20 = vld [vmem:[#allocation2 + $0x10] sm:$0xff] }
  0x14   :  { %v68_v16 = vld [vmem:[#allocation2] sm:$0xff]  ;;  %v69_v18 = vld [vmem:[#allocation2 + $0x8] sm:$0xff]  ;;  %v78_v21 = vld [vmem:[#allocation2 + $0x50] sm:$0xff] }
  0x15   :  { %107 = vmatpush.msra.mxu0 %v96_v3  ;;  %1013 = vmatpush.msra.mxu2 %v96_v3  ;;  %v76_v17 = vld [vmem:[#allocation2 + $0x40] sm:$0xff]  ;;  %v77_v19 = vld [vmem:[#allocation2 + $0x48] sm:$0xff]  ;;  %v71_v22 = vld [vmem:[#allocation2 + $0x18] sm:$0xff] }
  0x16   :  { %v79_v23 = vld [vmem:[#allocation2 + $0x58] sm:$0xff]  ;;  %v72_v24 = vld [vmem:[#allocation2 + $0x20] sm:$0xff]  ;;  %v73_v26 = vld [vmem:[#allocation2 + $0x28] sm:$0xff] }
  0x17   :  { %108 = vmatpush.msra.mxu0 %v95_v4  ;;  %1014 = vmatpush.msra.mxu2 %v95_v4  ;;  %v80_v25 = vld [vmem:[#allocation2 + $0x60] sm:$0xff]  ;;  %v81_v27 = vld [vmem:[#allocation2 + $0x68] sm:$0xff]  ;;  %v74_v28 = vld [vmem:[#allocation2 + $0x30] sm:$0xff] }
  0x18   :  { %v82_v29 = vld [vmem:[#allocation2 + $0x70] sm:$0xff]  ;;  %v75_v30 = vld [vmem:[#allocation2 + $0x38] sm:$0xff]  ;;  %v886_v34 = vld [vmem:[#allocation7 + $0x68] sm:$0xff] }
  0x19   :  { %109 = vmatpush.msra.mxu0 %v94_v5  ;;  %1015 = vmatpush.msra.mxu2 %v94_v5  ;;  %v83_v31 = vld [vmem:[#allocation2 + $0x78] sm:$0xff]  ;;  %v887_v33 = vld [vmem:[#allocation7 + $0x70] sm:$0xff]  ;;  %v1241_v35 = vld [vmem:[%s1894_s2] ss:$0 sm:$0xff] }
  0x1a   :  { %v888_v32 = vld [vmem:[#allocation7 + $0x78] sm:$0xff]  ;;  %v885_v36 = vld [vmem:[#allocation7 + $0x60] sm:$0xff]  ;;  %v883_v40 = vld [vmem:[#allocation7 + $0x50] sm:$0xff] }
  0x1b   :  { %110 = vmatpush.msra.mxu0 %v93_v6  ;;  %1016 = vmatpush.msra.mxu2 %v93_v6  ;;  %v884_v38 = vld [vmem:[#allocation7 + $0x58] sm:$0xff]  ;;  %v882_v42 = vld [vmem:[#allocation7 + $0x48] sm:$0xff]  ;;  %v881_v45 = vld [vmem:[#allocation7 + $0x40] sm:$0xff] }
  0x1c   :  { %893 = vmatpush.msra.mxu1 %v888_v32  ;;  %1026 = vmatpush.msra.mxu3 %v888_v32  ;;  %v880_v49 = vld [vmem:[#allocation7 + $0x38] sm:$0xff]  ;;  %v879_v56 = vld [vmem:[#allocation7 + $0x30] sm:$0xff]  ;;  %v878_v60 = vld [vmem:[#allocation7 + $0x28] sm:$0xff] }
  0x1d   :  { %111 = vmatpush.msra.mxu0 %v92_v7  ;;  %1017 = vmatpush.msra.mxu2 %v92_v7  ;;  %v877_v3 = vld [vmem:[#allocation7 + $0x20] sm:$0xff]  ;;  %v876_v7 = vld [vmem:[#allocation7 + $0x18] sm:$0xff] }
  0x1e   :  { %894 = vmatpush.msra.mxu1 %v887_v33  ;;  %1027 = vmatpush.msra.mxu3 %v887_v33 }
  0x1f   :  { %112 = vmatpush.msra.mxu0 %v91_v8  ;;  %1018 = vmatpush.msra.mxu2 %v91_v8 }
  0x20   :  { %895 = vmatpush.msra.mxu1 %v886_v34  ;;  %1028 = vmatpush.msra.mxu3 %v886_v34 }
  0x21   :  { %113 = vmatpush.msra.mxu0 %v90_v9  ;;  %1019 = vmatpush.msra.mxu2 %v90_v9 }
  0x22   :  { %896 = vmatpush.msra.mxu1 %v885_v36  ;;  %1029 = vmatpush.msra.mxu3 %v885_v36 }
  0x23   :  { %114 = vmatpush.msra.mxu0 %v89_v10  ;;  %1020 = vmatpush.msra.mxu2 %v89_v10 }
  0x24   :  { %897 = vmatpush.msra.mxu1 %v884_v38  ;;  %1030 = vmatpush.msra.mxu3 %v884_v38 }
  0x25   :  { %115 = vmatpush.msra.mxu0 %v88_v11  ;;  %1021 = vmatpush.msra.mxu2 %v88_v11 }
  0x26   :  { %898 = vmatpush.msra.mxu1 %v883_v40  ;;  %1031 = vmatpush.msra.mxu3 %v883_v40 }
  0x27   :  { %116 = vmatpush.msra.mxu0 %v87_v12  ;;  %1022 = vmatpush.msra.mxu2 %v87_v12 }
  0x28   :  { %899 = vmatpush.msra.mxu1 %v882_v42  ;;  %1032 = vmatpush.msra.mxu3 %v882_v42 }
  0x29   :  { %117 = vmatpush.msra.mxu0 %v86_v13  ;;  %1023 = vmatpush.msra.mxu2 %v86_v13  ;;  %v875_v13 = vld [vmem:[#allocation7 + $0x10] sm:$0xff] }
  0x2a   :  { %900 = vmatpush.msra.mxu1 %v881_v45  ;;  %1033 = vmatpush.msra.mxu3 %v881_v45 }
  0x2b   :  { %118 = vmatpush.msra.mxu0 %v85_v14  ;;  %1024 = vmatpush.msra.mxu2 %v85_v14 }
  0x2c   :  { %901 = vmatpush.msra.mxu1 %v880_v49  ;;  %1034 = vmatpush.msra.mxu3 %v880_v49 }
  0x2d   :  { %119 = vmatpush.msra.mxu0 %v84_v15  ;;  %1025 = vmatpush.msra.mxu2 %v84_v15 }
  0x2e   :  { %120 = vmatmul.f32.vlgmr.msra.gmra.mxu0 %v68_v16  ;;  %144 = vmatmul.f32.vlgmr.msra.gmra.mxu2 %v76_v17  ;;  %v874_v17 = vld [vmem:[#allocation7 + $0x8] sm:$0xff] }
  0x2f   :  { %902 = vmatpush.msra.mxu1 %v879_v56  ;;  %1035 = vmatpush.msra.mxu3 %v879_v56 }
  0x31   :  { %903 = vmatpush.msra.mxu1 %v878_v60  ;;  %1036 = vmatpush.msra.mxu3 %v878_v60 }
  0x33   :  { %904 = vmatpush.msra.mxu1 %v877_v3  ;;  %1037 = vmatpush.msra.mxu3 %v877_v3 }
  0x35   :  { %905 = vmatpush.msra.mxu1 %v876_v7  ;;  %1038 = vmatpush.msra.mxu3 %v876_v7 }
  0x36   :  { %123 = vmatmul.f32.gmra.mxu0 %v69_v18  ;;  %147 = vmatmul.f32.gmra.mxu2 %v77_v19 }
  0x37   :  { %906 = vmatpush.msra.mxu1 %v875_v13  ;;  %1039 = vmatpush.msra.mxu3 %v875_v13 }
  0x39   :  { %907 = vmatpush.msra.mxu1 %v874_v17  ;;  %1040 = vmatpush.msra.mxu3 %v874_v17 }
  0x3e   :  { %126 = vmatmul.f32.gmra.mxu0 %v70_v20  ;;  %150 = vmatmul.f32.gmra.mxu2 %v78_v21 }
  0x46   :  { %129 = vmatmul.f32.gmra.mxu0 %v71_v22  ;;  %153 = vmatmul.f32.gmra.mxu2 %v79_v23 }
  0x4e   :  { %132 = vmatmul.f32.gmra.mxu0 %v72_v24  ;;  %156 = vmatmul.f32.gmra.mxu2 %v80_v25  ;;  %v873_v25 = vld [vmem:[#allocation7] sm:$0xff] }
  0x4f   :  { %908 = vmatpush.msra.mxu1 %v873_v25  ;;  %1041 = vmatpush.msra.mxu3 %v873_v25 }
  0x56   :  { %135 = vmatmul.f32.gmra.mxu0 %v73_v26  ;;  %159 = vmatmul.f32.gmra.mxu2 %v81_v27 }
  0x5e   :  { %138 = vmatmul.f32.gmra.mxu0 %v74_v28  ;;  %162 = vmatmul.f32.gmra.mxu2 %v82_v29 }
  0x66   :  { %141 = vmatmul.f32.gmra.mxu0 %v75_v30  ;;  %165 = vmatmul.f32.gmra.mxu2 %v83_v31 }
  0xab   :  { %v121_v37 = vpop.f32.mrf.mxu0 }
  0xac   :  { %v1244_v39 = vadd.f32 %v1241_v35, %v121_v37 }
  0xae   :  { %v1247_v41 = vmul.f32 0.70710677, %v1244_v39  ;;  %v1350_v13 = vmul.f32 0.5, %v1244_v39 }
  0xb0   :  { %v201_v43 = vmul.f32 %v1247_v41, %v1247_v41 }
  0xb1   :  { %v145_v44 = vpop.f32.mrf.mxu2 }
  0xb2   :  { %v1251_v46 = vmin.f32 %v201_v43, 16.0  ;;  %v1254_v47 = vadd.f32 %v1241_v35, %v145_v44 }
  0xb3   :  { %v124_v48 = vpop.f32.mrf.mxu0 }
  0xb4   :  { %v1257_v50 = vmul.f32 0.70710677, %v1254_v47  ;;  %v1260_v51 = vadd.f32 %v1241_v35, %v124_v48  ;;  %v203_v52 = vmul.f32 2.1237322e-06, %v1251_v46  ;;  %v214_v53 = vmul.f32 3.8918573e-05, %v1251_v46 }
  0xb6   :  { %v521_v54 = vmul.f32 %v1257_v50, %v1257_v50  ;;  %v1267_v55 = vmul.f32 0.70710677, %v1260_v51  ;;  %v215_v57 = vadd.f32 0.001143296, %v214_v53  ;;  %v204_v61 = vadd.f32 0.00028619796, %v203_v52 }
  0xb8   :  { %v1269_v58 = vmin.f32 %v521_v54, 16.0  ;;  %v241_v59 = vmul.f32 %v1267_v55, %v1267_v55  ;;  %v216_v63 = vmul.f32 %v215_v57, %v1251_v46  ;;  %v205_v8 = vmul.f32 %v204_v61, %v1251_v46 }
  0xb9   :  { %v148_v62 = vpop.f32.mrf.mxu2 }
  0xba   :  { %v523_v0 = vmul.f32 2.1237322e-06, %v1269_v58  ;;  %v1275_v1 = vmin.f32 %v241_v59, 16.0  ;;  %v1278_v2 = vadd.f32 %v1241_v35, %v148_v62  ;;  %v217_v5 = vadd.f32 0.014752088, %v216_v63 }
  0xbb   :  { %v127_v4 = vpop.f32.mrf.mxu0  ;;  %v206_v19 = vadd.f32 0.0036580483, %v205_v8 }
  0xbc   :  { %v243_v6 = vmul.f32 2.1237322e-06, %v1275_v1  ;;  %v1283_v9 = vmul.f32 0.70710677, %v1278_v2  ;;  %v1286_v10 = vadd.f32 %v1241_v35, %v127_v4  ;;  %v218_v11 = vmul.f32 %v217_v5, %v1251_v46 }
  0xbd   :  { %v524_v12 = vadd.f32 0.00028619796, %v523_v0  ;;  %v207_v31 = vmul.f32 %v206_v19, %v1251_v46 }
  0xbe   :  { %v244_v14 = vadd.f32 0.00028619796, %v243_v6  ;;  %v561_v15 = vmul.f32 %v1283_v9, %v1283_v9  ;;  %v1292_v16 = vmul.f32 0.70710677, %v1286_v10  ;;  %v219_v18 = vadd.f32 0.112945676, %v218_v11 }
  0xbf   :  { %v525_v23 = vmul.f32 %v524_v12, %v1269_v58  ;;  %v208_v44 = vadd.f32 0.05243302, %v207_v31 }
  0xc0   :  { %v1294_v20 = vmin.f32 %v561_v15, 16.0  ;;  %v281_v21 = vmul.f32 %v1292_v16, %v1292_v16  ;;  %v245_v26 = vmul.f32 %v244_v14, %v1275_v1  ;;  %v220_v30 = vmul.f32 %v219_v18, %v1251_v46 }
  0xc1   :  { %v151_v22 = vpop.f32.mrf.mxu2  ;;  %v526_v34 = vadd.f32 0.0036580483, %v525_v23  ;;  %v209_v61 = vmul.f32 %v208_v44, %v1251_v46  ;;  %v1362_v23 = vmul.f32 0.5, %v1254_v47  ;;  %v1377_v47 = vmul.f32 0.5, %v1278_v2 }
  0xc2   :  { %v1300_v24 = vadd.f32 %v1241_v35, %v151_v22  ;;  %v563_v27 = vmul.f32 2.1237322e-06, %v1294_v20  ;;  %v1304_v29 = vmin.f32 %v281_v21, 16.0  ;;  %v246_v36 = vadd.f32 0.0036580483, %v245_v26 }
  0xc3   :  { %v130_v28 = vpop.f32.mrf.mxu0  ;;  %v221_v43 = vadd.f32 0.4994258, %v220_v30  ;;  %v527_v48 = vmul.f32 %v526_v34, %v1269_v58  ;;  %v210_v14 = vadd.f32 0.18741608, %v209_v61 }
  0xc4   :  { %v1309_v32 = vmul.f32 0.70710677, %v1300_v24  ;;  %v1312_v33 = vadd.f32 %v1241_v35, %v130_v28  ;;  %v564_v37 = vadd.f32 0.00028619796, %v563_v27  ;;  %v283_v40 = vmul.f32 2.1237322e-06, %v1304_v29 }
  0xc5   :  { %v247_v53 = vmul.f32 %v246_v36, %v1275_v1  ;;  %v222_v60 = vmul.f32 %v221_v43, %v1251_v46  ;;  %v528_v0 = vadd.f32 0.05243302, %v527_v48  ;;  %v211_v34 = vmul.f32 %v210_v14, %v1251_v46 }
  0xc6   :  { %v601_v38 = vmul.f32 %v1309_v32, %v1309_v32  ;;  %v1318_v42 = vmul.f32 0.70710677, %v1312_v33  ;;  %v565_v54 = vmul.f32 %v564_v37, %v1294_v20  ;;  %v284_v59 = vadd.f32 0.00028619796, %v283_v40 }
  0xc7   :  { %v248_v4 = vadd.f32 0.05243302, %v247_v53  ;;  %v1347_v12 = vadd.f32 1.0, %v222_v60  ;;  %v529_v18 = vmul.f32 %v528_v0, %v1269_v58  ;;  %v1374_v36 = vmul.f32 0.5, %v1260_v51 }
  0xc8   :  { %v321_v49 = vmul.f32 %v1318_v42, %v1318_v42  ;;  %v1328_v56 = vmin.f32 %v601_v38, 16.0  ;;  %v566_v5 = vadd.f32 0.0036580483, %v565_v54  ;;  %v285_v8 = vmul.f32 %v284_v59, %v1304_v29 }
  0xc9   :  { %v154_v45 = vpop.f32.mrf.mxu2  ;;  %v249_v39 = vmul.f32 %v248_v4, %v1275_v1  ;;  %1050 = vrcp.f32 %v1347_v12  ;;  %v530_v38 = vadd.f32 0.18741608, %v529_v18  ;;  %v1386_v48 = vmul.f32 0.5, %v1286_v10 }
  0xca   :  { %v1324_v52 = vadd.f32 %v1241_v35, %v154_v45  ;;  %v1332_v62 = vmin.f32 %v321_v49, 16.0  ;;  %v603_v6 = vmul.f32 2.1237322e-06, %v1328_v56  ;;  %v567_v25 = vmul.f32 %v566_v5, %v1294_v20 }
  0xcb   :  { %v133_v57 = vpop.f32.mrf.mxu0  ;;  %v286_v28 = vadd.f32 0.0036580483, %v285_v8  ;;  %v250_v45 = vadd.f32 0.18741608, %v249_v39  ;;  %v1390_v51 = vmul.f32 3.8918573e-05, %v1269_v58  ;;  %v531_v4 = vmul.f32 %v530_v38, %v1269_v58 }
  0xcc   :  { %v1335_v63 = vmul.f32 0.70710677, %v1324_v52  ;;  %v1338_v3 = vadd.f32 %v1241_v35, %v133_v57  ;;  %v323_v15 = vmul.f32 2.1237322e-06, %v1332_v62  ;;  %v604_v26 = vadd.f32 0.00028619796, %v603_v6 }
  0xcd   :  { %v568_v2 = vadd.f32 0.05243302, %v567_v25  ;;  %v287_v49 = vmul.f32 %v286_v28, %v1304_v29  ;;  %v212_v57 = vadd.f32 1.1283791, %v211_v34  ;;  %v1397_v59 = vmul.f32 0.5, %v1300_v24 }
  0xce   :  { %v641_v7 = vmul.f32 %v1335_v63, %v1335_v63  ;;  %v1345_v11 = vmul.f32 0.70710677, %v1338_v3  ;;  %v324_v37 = vadd.f32 0.00028619796, %v323_v15  ;;  %v605_v46 = vmul.f32 %v604_v26, %v1328_v56 }
  0xcf   :  { %v1403_v0 = vpop.eup %1050  ;;  %v251_v8 = vmul.f32 %v250_v45, %v1275_v1  ;;  %v1412_v14 = vmul.f32 0.5, %v1312_v33  ;;  %v569_v18 = vmul.f32 %v568_v2, %v1294_v20  ;;  %v1425_v33 = vmul.f32 %v212_v57, %v1247_v41 }
  0xd0   :  { %v1354_v19 = vmin.f32 %v641_v7, 16.0  ;;  %v361_v21 = vmul.f32 %v1345_v11, %v1345_v11  ;;  %v325_v60 = vmul.f32 %v324_v37, %v1332_v62  ;;  %v606_v24 = vadd.f32 0.0036580483, %v605_v46 }
  0xd1   :  { %v157_v17 = vpop.f32.mrf.mxu2  ;;  %v225_v34 = vmul.f32 %v1403_v0, %v1347_v12  ;;  %v532_v37 = vadd.f32 1.1283791, %v531_v4  ;;  %v1433_v46 = vmul.f32 0.5, %v1324_v52  ;;  %vm230_vm0 = vweird.f32 %v1403_v0 }
  0xd2   :  { %v1359_v22 = vadd.f32 %v1241_v35, %v157_v17  ;;  %v1366_v30 = vmin.f32 %v361_v21, 16.0  ;;  %v643_v40 = vmul.f32 2.1237322e-06, %v1354_v19  ;;  %v288_v21 = vadd.f32 0.05243302, %v287_v49 }
  0xd3   :  { %v136_v27 = vpop.f32.mrf.mxu0  ;;  %v326_v26 = vadd.f32 0.0036580483, %v325_v60  ;;  %v607_v45 = vmul.f32 %v606_v24, %v1328_v56  ;;  %v570_v49 = vadd.f32 0.18741608, %v569_v18  ;;  %v226_v52 = vsub.f32 1.0, %v225_v34 }
  0xd4   :  { %v1369_v31 = vmul.f32 0.70710677, %v1359_v22  ;;  %v1383_v44 = vadd.f32 %v1241_v35, %v136_v27  ;;  %v363_v53 = vmul.f32 2.1237322e-06, %v1366_v30  ;;  %v644_v5 = vadd.f32 0.00028619796, %v643_v40 }
  0xd5   :  { %v289_v60 = vmul.f32 %v288_v21, %v1304_v29  ;;  %v608_v18 = vadd.f32 0.05243302, %v607_v45  ;;  %vm229_vm1 = vweird.f32 %v1347_v12 }
  0xd6   :  { %v681_v43 = vmul.f32 %v1369_v31, %v1369_v31  ;;  %v1401_v10 = vmul.f32 0.70710677, %v1383_v44  ;;  %v364_v39 = vadd.f32 0.00028619796, %v363_v53  ;;  %v645_v38 = vmul.f32 %v644_v5, %v1354_v19  ;;  %vm1490_vm2 = vmor %vm229_vm1, %vm230_vm0 }
  0xd8   :  { %v1394_v54 = vmin.f32 %v681_v43, 16.0  ;;  %v401_v15 = vmul.f32 %v1401_v10, %v1401_v10  ;;  %v252_v43 = vadd.f32 1.1283791, %v251_v8  ;;  %v365_v53 = vmul.f32 %v364_v39, %v1366_v30 }
  0xd9   :  { %v160_v61 = vpop.f32.mrf.mxu2  ;;  %v646_v8 = vadd.f32 0.0036580483, %v645_v38 }
  0xda   :  { %v683_v6 = vmul.f32 2.1237322e-06, %v1394_v54  ;;  %v1408_v7 = vadd.f32 %v1241_v35, %v160_v61  ;;  %v1417_v27 = vmin.f32 %v401_v15, 16.0  ;;  %v327_v61 = vmul.f32 %v326_v26, %v1332_v62 }
  0xdb   :  { %v139_v17 = vpop.f32.mrf.mxu0  ;;  %v366_v26 = vadd.f32 0.0036580483, %v365_v53  ;;  %v1470_v53 = vmul.f32 0.5, %v1338_v3 }
  0xdc   :  { %v684_v25 = vadd.f32 0.00028619796, %v683_v6  ;;  %v1420_v28 = vadd.f32 %v1241_v35, %v139_v17  ;;  %v1429_v40 = vmul.f32 0.70710677, %v1408_v7  ;;  %v403_v2 = vmul.f32 2.1237322e-06, %v1417_v27 }
  0xdd   :  { %v1446_v6 = vmul.f32 %v532_v37, %v1257_v50  ;;  %v1451_v17 = vmul.f32 %v252_v43, %v1267_v55  ;;  %v290_v37 = vadd.f32 0.18741608, %v289_v60  ;;  %v328_v38 = vadd.f32 0.05243302, %v327_v61 }
  0xde   :  { %1904 = vst [vmem:[#allocation12_spill] sm:$0xff] %v1420_v28  ;;  %v685_v41 = vmul.f32 %v684_v25, %v1394_v54  ;;  %v721_v57 = vmul.f32 %v1429_v40, %v1429_v40  ;;  %v1443_v4 = vmul.f32 0.70710677, %v1420_v28  ;;  %v404_v24 = vadd.f32 0.00028619796, %v403_v2 }
  0xdf   :  { %v571_v25 = vmul.f32 %v570_v49, %v1294_v20  ;;  %v227_v55 = vmul.f32 %v1403_v0, %v226_v52  ;;  %v647_v43 = vmul.f32 %v646_v8, %v1354_v19  ;;  %v609_v49 = vmul.f32 %v608_v18, %v1328_v56 }
  0xe0   :  { %v1448_v15 = vmin.f32 %v721_v57, 16.0  ;;  %v441_v21 = vmul.f32 %v1443_v4, %v1443_v4  ;;  %v686_v34 = vadd.f32 0.0036580483, %v685_v41  ;;  %v405_v45 = vmul.f32 %v404_v24, %v1417_v27 }
  0xe1   :  { %v163_v5 = vpop.f32.mrf.mxu2  ;;  %v1473_v41 = vmul.f32 0.5, %v1359_v22  ;;  %v572_v61 = vadd.f32 1.1283791, %v571_v25  ;;  %v367_v52 = vmul.f32 %v366_v26, %v1366_v30  ;;  %v228_v18 = vadd.f32 %v1403_v0, %v227_v55 }
  0xe2   :  { %v1456_v39 = vadd.f32 %v1241_v35, %v163_v5  ;;  %v723_v50 = vmul.f32 2.1237322e-06, %v1448_v15  ;;  %v1460_v2 = vmin.f32 %v441_v21, 16.0  ;;  %v687_v8 = vmul.f32 %v686_v34, %v1394_v54 }
  0xe3   :  { %1907 = vst [vmem:[#allocation15_spill] sm:$0xff] %v1473_v41  ;;  %v291_v3 = vmul.f32 %v290_v37, %v1304_v29  ;;  %v329_v22 = vmul.f32 %v328_v38, %v1332_v62  ;;  %v406_v25 = vadd.f32 0.0036580483, %v405_v45  ;;  %v610_v28 = vadd.f32 0.18741608, %v609_v49 }
  0xe4   :  { %1905 = vst [vmem:[#allocation13_spill] sm:$0xff] %v1456_v39  ;;  %v724_v57 = vadd.f32 0.00028619796, %v723_v50  ;;  %v1466_v5 = vmul.f32 0.70710677, %v1456_v39  ;;  %v235_v37 = vand.u32 2147483648, %v1347_v12  ;;  %v232_v45 = vsel %vm1490_vm2, %v1403_v0, %v228_v18  ;;  %v142_v0 = vpop.f32.mrf.mxu0 }
  0xe5   :  { %v443_v60 = vmul.f32 2.1237322e-06, %v1460_v2  ;;  %v648_v39 = vadd.f32 0.05243302, %v647_v43  ;;  %v233_v34 = vand.u32 2147483647, %v1347_v12  ;;  %v611_v41 = vmul.f32 %v610_v28, %v1328_v56 }
  0xe6   :  { %1906 = vst [vmem:[#allocation14_spill] sm:$0xff] %v1466_v5  ;;  %v725_v24 = vmul.f32 %v724_v57, %v1448_v15  ;;  %v761_v50 = vmul.f32 %v1466_v5, %v1466_v5  ;;  %v1488_v57 = vmul.f32 %v572_v61, %v1283_v9  ;;  %v688_v5 = vadd.f32 0.05243302, %v687_v8 }
  0xe7   :  { %v444_v21 = vadd.f32 0.00028619796, %v443_v60  ;;  %v368_v60 = vadd.f32 0.05243302, %v367_v52  ;;  %v535_v49 = vadd.f32 0.001143296, %v1390_v51  ;;  %v649_v61 = vmul.f32 %v648_v39, %v1354_v19 }
  0xe8   :  { %v726_v26 = vadd.f32 0.0036580483, %v725_v24  ;;  %v1496_v43 = vmin.f32 %v761_v50, 16.0  ;;  %v330_v9 = vadd.f32 0.18741608, %v329_v22  ;;  %v407_v52 = vmul.f32 %v406_v25, %v1417_v27 }
  0xe9   :  { %v445_v38 = vmul.f32 %v444_v21, %v1460_v2  ;;  %v236_v8 = vor.u32 1.1754944e-38, %v235_v37  ;;  %v292_v24 = vadd.f32 1.1283791, %v291_v3  ;;  %vm234_vm3 = vcmp.eq.f32.partialorder %v233_v34, 8.507059e+37 }
  0xea   :  { %v727_v12 = vmul.f32 %v726_v26, %v1448_v15  ;;  %v369_v21 = vmul.f32 %v368_v60, %v1366_v30  ;;  %v689_v50 = vmul.f32 %v688_v5, %v1394_v54  ;;  %v536_v51 = vmul.f32 %v535_v49, %v1269_v58 }
  0xeb   :  { %v237_v55 = vsel %vm234_vm3, %v236_v8, %v232_v45  ;;  %v1510_v18 = vmul.f32 0.5, %v1383_v44  ;;  %v446_v39 = vadd.f32 0.0036580483, %v445_v38  ;;  %v763_v22 = vmul.f32 2.1237322e-06, %v1496_v43 }
  0xec   :  { %v238_v3 = vmul.f32 %v237_v55, %v1425_v33  ;;  %v331_v28 = vmul.f32 %v330_v9, %v1332_v62  ;;  %v650_v25 = vadd.f32 0.18741608, %v649_v61  ;;  %v408_v26 = vadd.f32 0.05243302, %v407_v52 }
  0xed   :  { %1910 = vst [vmem:[#allocation16_spill] sm:$0xff] %v1510_v18  ;;  %v537_v34 = vadd.f32 0.014752088, %v536_v51  ;;  %v612_v60 = vadd.f32 1.1283791, %v611_v41  ;;  %v1516_v45 = vadd.f32 %v1241_v35, %v142_v0  ;;  %v1521_v18 = vmul.f32 0.5, %v1408_v7 }
  0xee   :  { %v728_v37 = vadd.f32 0.05243302, %v727_v12  ;;  %v994_v5 = vclamps-f32 %v238_v3, 1.0  ;;  %v370_v49 = vadd.f32 0.18741608, %v369_v21  ;;  %v447_v33 = vmul.f32 %v446_v39, %v1460_v2 }
  0xef   :  { %1911 = vst [vmem:[#allocation17_spill] sm:$0xff] %v1516_v45  ;;  %v690_v8 = vadd.f32 0.18741608, %v689_v50  ;;  %v538_v44 = vmul.f32 %v537_v34, %v1269_v58  ;;  %v254_v38 = vmul.f32 3.8918573e-05, %v1275_v1  ;;  %v651_v41 = vmul.f32 %v650_v25, %v1354_v19 }
  0xf0   :  { %v764_v9 = vadd.f32 0.00028619796, %v763_v22  ;;  %v841_v61 = vadd.f32 1.0, %v994_v5  ;;  %v332_v52 = vadd.f32 1.1283791, %v331_v28  ;;  %v409_v12 = vmul.f32 %v408_v26, %v1417_v27 }
  0xf1   :  { %v539_v55 = vadd.f32 0.112945676, %v538_v44  ;;  %v729_v21 = vmul.f32 %v728_v37, %v1448_v15  ;;  %v1529_v0 = vmul.f32 0.70710677, %v1516_v45  ;;  %v255_v51 = vadd.f32 0.001143296, %v254_v38 }
  0xf2   :  { %v857_v50 = vmul.f32 %v841_v61, %v1350_v13  ;;  %v371_v7 = vmul.f32 %v370_v49, %v1366_v30  ;;  %v691_v39 = vmul.f32 %v690_v8, %v1394_v54  ;;  %v574_v3 = vmul.f32 3.8918573e-05, %v1294_v20 }
  0xf3   :  { %v540_v22 = vmul.f32 %v539_v55, %v1269_v58  ;;  %v448_v28 = vadd.f32 0.05243302, %v447_v33  ;;  %v765_v25 = vmul.f32 %v764_v9, %v1496_v43  ;;  %v256_v26 = vmul.f32 %v255_v51, %v1275_v1 }
  0xf4   :  { %909 = vmatmul.f32.vlgmr.msra.gmra.mxu1 %v857_v50  ;;  %v294_v13 = vmul.f32 3.8918573e-05, %v1304_v29  ;;  %v1539_v34 = vmul.f32 %v292_v24, %v1292_v16  ;;  %v410_v37 = vadd.f32 0.18741608, %v409_v12  ;;  %v575_v49 = vadd.f32 0.001143296, %v574_v3 }
  0xf5   :  { %v541_v5 = vadd.f32 0.4994258, %v540_v22  ;;  %v730_v44 = vadd.f32 0.18741608, %v729_v21  ;;  %v481_v8 = vmul.f32 %v1529_v0, %v1529_v0  ;;  %v257_v38 = vadd.f32 0.014752088, %v256_v26  ;;  %v166_v22 = vpop.f32.mrf.mxu2 }
  0xf6   :  { %v295_v61 = vadd.f32 0.001143296, %v294_v13  ;;  %v652_v33 = vadd.f32 1.1283791, %v651_v41  ;;  %v372_v55 = vadd.f32 1.1283791, %v371_v7  ;;  %v449_v51 = vmul.f32 %v448_v28, %v1460_v2 }
  0xf7   :  { %v692_v9 = vadd.f32 1.1283791, %v691_v39  ;;  %v542_v50 = vmul.f32 %v541_v5, %v1269_v58  ;;  %v766_v45 = vadd.f32 0.0036580483, %v765_v25  ;;  %v258_v16 = vmul.f32 %v257_v38, %v1275_v1 }
  0xf8   :  { %v576_v24 = vmul.f32 %v575_v49, %v1294_v20  ;;  %v411_v12 = vmul.f32 %v410_v37, %v1417_v27  ;;  %v296_v3 = vmul.f32 %v295_v61, %v1304_v29  ;;  %v614_v41 = vmul.f32 3.8918573e-05, %v1328_v56 }
  0xf9   :  { %v1548_v21 = vadd.f32 1.0, %v542_v50  ;;  %v731_v7 = vmul.f32 %v730_v44, %v1448_v15  ;;  %v1553_v39 = vmin.f32 %v481_v8, 16.0  ;;  %v259_v58 = vadd.f32 0.112945676, %v258_v16 }
  0xfa   :  { %v577_v28 = vadd.f32 0.014752088, %v576_v24  ;;  %v1556_v25 = vmul.f32 %v612_v60, %v1309_v32  ;;  %v1559_v26 = vmul.f32 %v332_v52, %v1318_v42  ;;  %v1562_v13 = vmul.f32 %v652_v33, %v1335_v63 }
  0xfb   :  { %1052 = vrcp.f32 %v1548_v21  ;;  %v450_v37 = vadd.f32 0.18741608, %v449_v51  ;;  %v767_v5 = vmul.f32 %v766_v45, %v1496_v43  ;;  %v1567_v49 = vadd.f32 %v1241_v35, %v166_v22 }
  0xfc   :  { %v260_v44 = vmul.f32 %v259_v58, %v1275_v1  ;;  %v1571_v8 = vmul.f32 %v372_v55, %v1345_v11  ;;  %v578_v32 = vmul.f32 %v577_v28, %v1294_v20  ;;  %v297_v42 = vadd.f32 0.014752088, %v296_v3 }
  0xfd   :  { %1912 = vst [vmem:[#allocation18_spill] sm:$0xff] %v1567_v49  ;;  %v615_v60 = vadd.f32 0.001143296, %v614_v41  ;;  %v1575_v63 = vmul.f32 %v692_v9, %v1369_v31  ;;  %v412_v52 = vadd.f32 1.1283791, %v411_v12  ;;  %v451_v11 = vmul.f32 %v450_v37, %v1460_v2 }
  0xfe   :  { %v732_v38 = vadd.f32 1.1283791, %v731_v7  ;;  %v483_v61 = vmul.f32 2.1237322e-06, %v1553_v39  ;;  %v261_v45 = vadd.f32 0.4994258, %v260_v44  ;;  %v298_v35 = vmul.f32 %v297_v42, %v1304_v29 }
  0xff   :  { %v579_v33 = vadd.f32 0.112945676, %v578_v32  ;;  %v616_v50 = vmul.f32 %v615_v60, %v1328_v56  ;;  %v768_v55 = vadd.f32 0.05243302, %v767_v5  ;;  %v1582_v51 = vmul.f32 0.70710677, %v1567_v49 }
 0x100   :  { %v334_v16 = vmul.f32 3.8918573e-05, %v1332_v62  ;;  %v262_v9 = vmul.f32 %v261_v45, %v1275_v1  ;;  %v299_v12 = vadd.f32 0.112945676, %v298_v35  ;;  %v1588_v3 = vmul.f32 %v412_v52, %v1401_v10 }
 0x101   :  { %1913 = vst [vmem:[#allocation19_spill] sm:$0xff] %v1582_v51  ;;  %v1053_v31 = vpop.eup %1052  ;;  %v580_v24 = vmul.f32 %v579_v33, %v1294_v20  ;;  %v617_v22 = vadd.f32 0.014752088, %v616_v50  ;;  %v1591_v41 = vmul.f32 %v732_v38, %v1429_v40  ;;  %v484_v7 = vadd.f32 0.00028619796, %v483_v61 }
 0x102   :  { %v545_v58 = vmul.f32 %v1053_v31, %v1548_v21  ;;  %v1594_v28 = vadd.f32 1.0, %v262_v9  ;;  %v300_v5 = vmul.f32 %v299_v12, %v1304_v29  ;;  %v1598_v44 = vadd.f32 1.1283791, %v451_v11 }
 0x103   :  { %v581_v37 = vadd.f32 0.4994258, %v580_v24  ;;  %v618_v1 = vmul.f32 %v617_v22, %v1328_v56  ;;  %v769_v32 = vmul.f32 %v768_v55, %v1496_v43  ;;  %v335_v10 = vadd.f32 0.001143296, %v334_v16 }
 0x104   :  { %v546_v42 = vsub.f32 1.0, %v545_v58  ;;  %v553_v60 = vand.u32 2147483647, %v1548_v21  ;;  %v555_v40 = vand.u32 2147483648, %v1548_v21  ;;  %v801_v52 = vmul.f32 %v1582_v51, %v1582_v51 }
 0x105   :  { %1054 = vrcp.f32 %v1594_v28  ;;  %vm550_vm4 = vweird.f32 %v1053_v31  ;;  %v582_v61 = vmul.f32 %v581_v37, %v1294_v20  ;;  %v301_v45 = vadd.f32 0.4994258, %v300_v5 }
 0x106   :  { %v547_v38 = vmul.f32 %v1053_v31, %v546_v42  ;;  %v485_v33 = vmul.f32 %v484_v7, %v1553_v39  ;;  %v619_v35 = vadd.f32 0.112945676, %v618_v1  ;;  %v336_v50 = vmul.f32 %v335_v10, %v1332_v62 }
 0x107   :  { %v654_v11 = vmul.f32 3.8918573e-05, %v1354_v19  ;;  %vm549_vm5 = vweird.f32 %v1548_v21  ;;  %v1611_v16 = vadd.f32 1.0, %v582_v61  ;;  %v302_v9 = vmul.f32 %v301_v45, %v1304_v29 }
 0x108   :  { %v548_v55 = vadd.f32 %v1053_v31, %v547_v38  ;;  %v1614_v24 = vadd.f32 0.18741608, %v769_v32  ;;  %vm551_vm6 = vmor %vm549_vm5, %vm550_vm4  ;;  %vm554_vm7 = vcmp.eq.f32.partialorder %v553_v60, 8.507059e+37  ;;  %v556_v20 = vor.u32 1.1754944e-38, %v555_v40 }
 0x109   :  { %v1616_v12 = vmin.f32 %v801_v52, 16.0  ;;  %v273_v7 = vand.u32 2147483647, %v1594_v28  ;;  %1056 = vrcp.f32 %v1611_v16  ;;  %v620_v58 = vmul.f32 %v619_v35, %v1328_v56 }
 0x10a   :  { %v552_v22 = vsel %vm551_vm6, %v1053_v31, %v548_v55  ;;  %v1621_v5 = vadd.f32 1.0, %v302_v9  ;;  %v337_v1 = vadd.f32 0.014752088, %v336_v50  ;;  %v655_v29 = vadd.f32 0.001143296, %v654_v11 }
 0x10b   :  { %v1055_v37 = vpop.eup %1054  ;;  %v557_v21 = vsel %vm554_vm7, %v556_v20, %v552_v22  ;;  %v1623_v32 = vadd.f32 0.0036580483, %v485_v33  ;;  %v275_v31 = vand.u32 2147483648, %v1594_v28  ;;  %v1629_v60 = vmul.f32 2.1237322e-06, %v1616_v12 }
 0x10c   :  { %v558_v42 = vmul.f32 %v557_v21, %v1446_v6  ;;  %v265_v10 = vmul.f32 %v1055_v37, %v1594_v28  ;;  %vm269_vm8 = vweird.f32 %v1594_v28  ;;  %v593_v40 = vand.u32 2147483647, %v1611_v16 }
 0x10d   :  { %1058 = vrcp.f32 %v1621_v5  ;;  %vm1634_vm9 = vcmp.eq.f32.partialorder %v273_v7, 8.507059e+37  ;;  %v595_v6 = vand.u32 2147483648, %v1611_v16  ;;  %v621_v45 = vadd.f32 0.4994258, %v620_v58 }
 0x10e   :  { %v1002_v52 = vclamps-f32 %v558_v42, 1.0  ;;  %v266_v38 = vsub.f32 1.0, %v265_v10  ;;  %v338_v33 = vmul.f32 %v337_v1, %v1332_v62  ;;  %v656_v35 = vmul.f32 %v655_v29, %v1354_v19 }
 0x10f   :  { %v374_v50 = vmul.f32 3.8918573e-05, %v1366_v30  ;;  %v1057_v11 = vpop.eup %1056  ;;  %vm270_vm10 = vweird.f32 %v1055_v37  ;;  %v276_v20 = vor.u32 1.1754944e-38, %v275_v31  ;;  %vm589_vm11 = vweird.f32 %v1611_v16 }
 0x110   :  { %v849_v55 = vadd.f32 1.0, %v1002_v52  ;;  %v267_v9 = vmul.f32 %v1055_v37, %v266_v38  ;;  %v585_v22 = vmul.f32 %v1057_v11, %v1611_v16  ;;  %vm1644_vm12 = vcmp.eq.f32.partialorder %v593_v40, 8.507059e+37  ;;  %vm271_vm13 = vmor %vm269_vm8, %vm270_vm10 }
 0x111   :  { %v622_v58 = vmul.f32 %v621_v45, %v1328_v56  ;;  %v596_v29 = vor.u32 1.1754944e-38, %v595_v6  ;;  %v339_v42 = vadd.f32 0.112945676, %v338_v33  ;;  %v657_v38 = vadd.f32 0.014752088, %v656_v35 }
 0x112   :  { %v865_v21 = vmul.f32 %v849_v55, %v1362_v23  ;;  %v268_v1 = vadd.f32 %v1055_v37, %v267_v9  ;;  %v586_v31 = vsub.f32 1.0, %v585_v22  ;;  %v375_v49 = vadd.f32 0.001143296, %v374_v50 }
 0x113   :  { %v1059_v10 = vpop.eup %1058  ;;  %v1652_v52 = vadd.f32 1.0, %v622_v58  ;;  %v313_v56 = vand.u32 2147483647, %v1621_v5  ;;  %v340_v23 = vmul.f32 %v339_v42, %v1332_v62  ;;  %vm590_vm14 = vweird.f32 %v1057_v11 }
 0x114   :  { %933 = vmatmul.f32.vlgmr.msra.gmra.mxu3 %v865_v21  ;;  %v272_v40 = vsel %vm271_vm13, %v1055_v37, %v268_v1  ;;  %v305_v51 = vmul.f32 %v1059_v10, %v1621_v5  ;;  %v587_v45 = vmul.f32 %v1057_v11, %v586_v31  ;;  %vm309_vm15 = vweird.f32 %v1621_v5  ;;  %vm591_vm0 = vmor %vm589_vm11, %vm590_vm14 }
 0x115   :  { %v277_v6 = vsel %vm1634_vm9, %v276_v20, %v272_v40  ;;  %1060 = vrcp.f32 %v1652_v52  ;;  %v315_v37 = vand.u32 2147483648, %v1621_v5  ;;  %v341_v50 = vadd.f32 0.4994258, %v340_v23 }
 0x116   :  { %v278_v28 = vmul.f32 %v277_v6, %v1451_v17  ;;  %v306_v33 = vsub.f32 1.0, %v305_v51  ;;  %v588_v35 = vadd.f32 %v1057_v11, %v587_v45  ;;  %v658_v55 = vmul.f32 %v657_v38, %v1354_v19 }
 0x117   :  { %v376_v9 = vmul.f32 %v375_v49, %v1366_v30  ;;  %vm310_vm1 = vweird.f32 %v1059_v10  ;;  %vm1667_vm2 = vcmp.eq.f32.partialorder %v313_v56, 8.507059e+37  ;;  %v342_v51 = vmul.f32 %v341_v50, %v1332_v62 }
 0x118   :  { %v995_v22 = vclamps-f32 %v278_v28, 1.0  ;;  %v307_v61 = vmul.f32 %v1059_v10, %v306_v33  ;;  %v592_v17 = vsel %vm591_vm0, %v1057_v11, %v588_v35  ;;  %v659_v58 = vadd.f32 0.112945676, %v658_v55  ;;  %vm311_vm3 = vmor %vm309_vm15, %vm310_vm1 }
 0x119   :  { %v377_v21 = vadd.f32 0.014752088, %v376_v9  ;;  %v597_v42 = vsel %vm1644_vm12, %v596_v29, %v592_v17  ;;  %v316_v31 = vor.u32 1.1754944e-38, %v315_v37  ;;  %v1677_v40 = vadd.f32 1.0, %v342_v51 }
 0x11a   :  { %v842_v1 = vadd.f32 1.0, %v995_v22  ;;  %v308_v49 = vadd.f32 %v1059_v10, %v307_v61  ;;  %v598_v16 = vmul.f32 %v597_v42, %v1488_v57  ;;  %v660_v11 = vmul.f32 %v659_v58, %v1354_v19 }
 0x11b   :  { %v1061_v38 = vpop.eup %1060  ;;  %v378_v62 = vmul.f32 %v377_v21, %v1366_v30  ;;  %v633_v29 = vand.u32 2147483647, %v1652_v52  ;;  %1062 = vrcp.f32 %v1677_v40  ;;  %v694_v5 = vmul.f32 3.8918573e-05, %v1394_v54 }
 0x11c   :  { %v858_v56 = vmul.f32 %v842_v1, %v1374_v36  ;;  %v312_v23 = vsel %vm311_vm3, %v1059_v10, %v308_v49  ;;  %v625_v7 = vmul.f32 %v1061_v38, %v1652_v52  ;;  %v1003_v6 = vclamps-f32 %v598_v16, 1.0 }
 0x11d   :  { %v317_v57 = vsel %vm1667_vm2, %v316_v31, %v312_v23  ;;  %v1689_v45 = vadd.f32 0.00028619796, %v1629_v60  ;;  %v635_v10 = vand.u32 2147483648, %v1652_v52  ;;  %vm629_vm4 = vweird.f32 %v1652_v52 }
 0x11e   :  { %912 = vmatmul.f32.gmra.mxu1 %v858_v56  ;;  %v318_v28 = vmul.f32 %v317_v57, %v1539_v34  ;;  %v626_v36 = vsub.f32 1.0, %v625_v7  ;;  %v850_v33 = vadd.f32 1.0, %v1003_v6  ;;  %v661_v37 = vadd.f32 0.4994258, %v660_v11 }
 0x11f   :  { %v379_v35 = vadd.f32 0.112945676, %v378_v62  ;;  %vm630_vm5 = vweird.f32 %v1061_v38  ;;  %vm1694_vm6 = vcmp.eq.f32.partialorder %v633_v29, 8.507059e+37  ;;  %v695_v61 = vadd.f32 0.001143296, %v694_v5 }
 0x120   :  { %v996_v50 = vclamps-f32 %v318_v28, 1.0  ;;  %v627_v55 = vmul.f32 %v1061_v38, %v626_v36  ;;  %v866_v60 = vmul.f32 %v850_v33, %v1377_v47  ;;  %v662_v22 = vmul.f32 %v661_v37, %v1354_v19  ;;  %vm631_vm7 = vmor %vm629_vm4, %vm630_vm5 }
 0x121   :  { %v380_v34 = vmul.f32 %v379_v35, %v1366_v30  ;;  %v636_v51 = vor.u32 1.1754944e-38, %v635_v10  ;;  %v353_v58 = vand.u32 2147483647, %v1677_v40  ;;  %v1063_v21 = vpop.eup %1062  ;;  %v696_v47 = vmul.f32 %v695_v61, %v1394_v54 }
 0x122   :  { %v843_v20 = vadd.f32 1.0, %v996_v50  ;;  %v628_v17 = vadd.f32 %v1061_v38, %v627_v55  ;;  %936 = vmatmul.f32.gmra.mxu3 %v866_v60  ;;  %v1704_v1 = vadd.f32 1.0, %v662_v22  ;;  %v414_v19 = vmul.f32 3.8918573e-05, %v1417_v27 }
 0x123   :  { %v381_v42 = vadd.f32 0.4994258, %v380_v34  ;;  %v345_v16 = vmul.f32 %v1063_v21, %v1677_v40  ;;  %vm349_vm8 = vweird.f32 %v1677_v40  ;;  %v355_v52 = vand.u32 2147483648, %v1677_v40 }
 0x124   :  { %v859_v49 = vmul.f32 %v843_v20, %v1386_v48  ;;  %v632_v31 = vsel %vm631_vm7, %v1061_v38, %v628_v17  ;;  %1064 = vrcp.f32 %v1704_v1  ;;  %v734_v62 = vmul.f32 3.8918573e-05, %v1448_v15 }
 0x125   :  { %v637_v11 = vsel %vm1694_vm6, %v636_v51, %v632_v31  ;;  %v346_v23 = vsub.f32 1.0, %v345_v16  ;;  %vm1717_vm9 = vcmp.eq.f32.partialorder %v353_v58, 8.507059e+37  ;;  %v382_v38 = vmul.f32 %v381_v42, %v1366_v30 }
 0x126   :  { %915 = vmatmul.f32.gmra.mxu1 %v859_v49  ;;  %v638_v56 = vmul.f32 %v637_v11, %v1556_v25  ;;  %vm350_vm10 = vweird.f32 %v1063_v21  ;;  %v697_v7 = vadd.f32 0.014752088, %v696_v47  ;;  %v415_v29 = vadd.f32 0.001143296, %v414_v19 }
 0x127   :  { %v454_v6 = vmul.f32 3.8918573e-05, %v1460_v2  ;;  %v347_v5 = vmul.f32 %v1063_v21, %v346_v23  ;;  %v673_v28 = vand.u32 2147483647, %v1704_v1  ;;  %v1724_v36 = vadd.f32 1.0, %v382_v38  ;;  %vm351_vm11 = vmor %vm349_vm8, %vm350_vm10 }
 0x128   :  { %v1004_v57 = vclamps-f32 %v638_v56, 1.0  ;;  %v356_v10 = vor.u32 1.1754944e-38, %v355_v52  ;;  %v675_v25 = vand.u32 2147483648, %v1704_v1  ;;  %v698_v33 = vmul.f32 %v697_v7, %v1394_v54 }
 0x129   :  { %v735_v37 = vadd.f32 0.001143296, %v734_v62  ;;  %v348_v50 = vadd.f32 %v1063_v21, %v347_v5  ;;  %1066 = vrcp.f32 %v1724_v36  ;;  %v416_v30 = vmul.f32 %v415_v29, %v1417_v27 }
 0x12a   :  { %v851_v35 = vadd.f32 1.0, %v1004_v57  ;;  %v1065_v55 = vpop.eup %1064  ;;  %vm669_vm12 = vweird.f32 %v1704_v1  ;;  %v699_v9 = vadd.f32 0.112945676, %v698_v33  ;;  %v455_v22 = vadd.f32 0.001143296, %v454_v6 }
 0x12b   :  { %v736_v60 = vmul.f32 %v735_v37, %v1448_v15  ;;  %v352_v61 = vsel %vm351_vm11, %v1063_v21, %v348_v50  ;;  %v665_v20 = vmul.f32 %v1065_v55, %v1704_v1  ;;  %vm1737_vm13 = vcmp.eq.f32.partialorder %v673_v28, 8.507059e+37 }
 0x12c   :  { %v867_v34 = vmul.f32 %v851_v35, %v1397_v59  ;;  %v357_v51 = vsel %vm1717_vm9, %v356_v10, %v352_v61  ;;  %v676_v40 = vor.u32 1.1754944e-38, %v675_v25  ;;  %v393_v58 = vand.u32 2147483647, %v1724_v36 }
 0x12d   :  { %v700_v42 = vmul.f32 %v699_v9, %v1394_v54  ;;  %v358_v47 = vmul.f32 %v357_v51, %v1559_v26  ;;  %v666_v19 = vsub.f32 1.0, %v665_v20  ;;  %v417_v59 = vadd.f32 0.014752088, %v416_v30 }
 0x12e   :  { %939 = vmatmul.f32.gmra.mxu3 %v867_v34  ;;  %v737_v21 = vadd.f32 0.014752088, %v736_v60  ;;  %vm670_vm14 = vweird.f32 %v1065_v55  ;;  %v456_v31 = vmul.f32 %v455_v22, %v1460_v2  ;;  %v774_v16 = vmul.f32 3.8918573e-05, %v1496_v43 }
 0x12f   :  { %v701_v49 = vadd.f32 0.4994258, %v700_v42  ;;  %v1067_v11 = vpop.eup %1066  ;;  %v997_v52 = vclamps-f32 %v358_v47, 1.0  ;;  %v667_v62 = vmul.f32 %v1065_v55, %v666_v19  ;;  %v418_v56 = vmul.f32 %v417_v59, %v1417_v27  ;;  %vm671_vm15 = vmor %vm669_vm12, %vm670_vm14 }
 0x130   :  { %v738_v23 = vmul.f32 %v737_v21, %v1448_v15  ;;  %v385_v48 = vmul.f32 %v1067_v11, %v1724_v36  ;;  %v395_v26 = vand.u32 2147483648, %v1724_v36  ;;  %v457_v7 = vadd.f32 0.014752088, %v456_v31 }
 0x131   :  { %v702_v38 = vmul.f32 %v701_v49, %v1394_v54  ;;  %v844_v29 = vadd.f32 1.0, %v997_v52  ;;  %v668_v6 = vadd.f32 %v1065_v55, %v667_v62  ;;  %v419_v57 = vadd.f32 0.112945676, %v418_v56 }
 0x132   :  { %v739_v5 = vadd.f32 0.112945676, %v738_v23  ;;  %v386_v28 = vsub.f32 1.0, %v385_v48  ;;  %v458_v25 = vmul.f32 %v457_v7, %v1460_v2  ;;  %v775_v33 = vadd.f32 0.001143296, %v774_v16 }
 0x133   :  { %v1756_v10 = vadd.f32 1.0, %v702_v38  ;;  %v860_v37 = vmul.f32 %v844_v29, %v1412_v14  ;;  %v672_v35 = vsel %vm671_vm15, %v1065_v55, %v668_v6  ;;  %v420_v54 = vmul.f32 %v419_v57, %v1417_v27 }
 0x134   :  { %v740_v50 = vmul.f32 %v739_v5, %v1448_v15  ;;  %v677_v30 = vsel %vm1737_vm13, %v676_v40, %v672_v35  ;;  %v387_v9 = vmul.f32 %v1067_v11, %v386_v28  ;;  %vm390_vm0 = vweird.f32 %v1067_v11 }
 0x135   :  { %1068 = vrcp.f32 %v1756_v10  ;;  %918 = vmatmul.f32.gmra.mxu1 %v860_v37  ;;  %v678_v1 = vmul.f32 %v677_v30, %v1562_v13  ;;  %vm389_vm1 = vweird.f32 %v1724_v36  ;;  %vm1767_vm2 = vcmp.eq.f32.partialorder %v393_v58, 8.507059e+37 }
 0x136   :  { %v421_v14 = vadd.f32 0.4994258, %v420_v54  ;;  %v388_v55 = vadd.f32 %v1067_v11, %v387_v9  ;;  %v741_v22 = vadd.f32 0.4994258, %v740_v50  ;;  %v459_v34 = vadd.f32 0.112945676, %v458_v25  ;;  %vm391_vm3 = vmor %vm389_vm1, %vm390_vm0 }
 0x137   :  { %v776_v61 = vmul.f32 %v775_v33, %v1496_v43  ;;  %v1005_v20 = vclamps-f32 %v678_v1, 1.0  ;;  %v396_v17 = vor.u32 1.1754944e-38, %v395_v26  ;;  %v494_v40 = vmul.f32 3.8918573e-05, %v1553_v39 }
 0x138   :  { %v422_v51 = vmul.f32 %v421_v14, %v1417_v27  ;;  %v392_v13 = vsel %vm391_vm3, %v1067_v11, %v388_v55  ;;  %v742_v36 = vmul.f32 %v741_v22, %v1448_v15  ;;  %v460_v58 = vmul.f32 %v459_v34, %v1460_v2 }
 0x139   :  { %v777_v42 = vadd.f32 0.014752088, %v776_v61  ;;  %v487_v47 = vmul.f32 %v1623_v32, %v1553_v39  ;;  %v852_v19 = vadd.f32 1.0, %v1005_v20  ;;  %v397_v59 = vsel %vm1767_vm2, %v396_v17, %v392_v13  ;;  %v1934_v13 = vld [vmem:[#allocation12_spill] sm:$0xff] }
 0x13a   :  { %v1780_v21 = vadd.f32 1.0, %v422_v51  ;;  %v805_v27 = vmul.f32 %v1689_v45, %v1616_v12  ;;  %v398_v31 = vmul.f32 %v397_v59, %v1571_v8  ;;  %v1785_v16 = vadd.f32 1.0, %v742_v36 }
 0x13b   :  { %v1069_v49 = vpop.eup %1068  ;;  %v461_v15 = vadd.f32 0.4994258, %v460_v58  ;;  %v868_v11 = vmul.f32 %v852_v19, %v1433_v46  ;;  %v778_v32 = vmul.f32 %v777_v42, %v1496_v43  ;;  %v1793_v62 = vmul.f32 %v1598_v44, %v1443_v4 }
 0x13c   :  { %v705_v52 = vmul.f32 %v1069_v49, %v1756_v10  ;;  %1070 = vrcp.f32 %v1780_v21  ;;  %v998_v56 = vclamps-f32 %v398_v31, 1.0  ;;  %v713_v45 = vand.u32 2147483647, %v1756_v10 }
 0x13d   :  { %v495_v23 = vadd.f32 0.001143296, %v494_v40  ;;  %v1798_v8 = vmul.f32 %v1614_v24, %v1496_v43  ;;  %942 = vmatmul.f32.gmra.mxu3 %v868_v11  ;;  %v715_v48 = vand.u32 2147483648, %v1756_v10  ;;  %1072 = vrcp.f32 %v1785_v16 }
 0x13e   :  { %v706_v46 = vsub.f32 1.0, %v705_v52  ;;  %v1802_v26 = vadd.f32 0.05243302, %v487_v47  ;;  %v1804_v38 = vadd.f32 0.0036580483, %v805_v27  ;;  %v845_v4 = vadd.f32 1.0, %v998_v56 }
 0x13f   :  { %vm709_vm4 = vweird.f32 %v1756_v10  ;;  %vm710_vm5 = vweird.f32 %v1069_v49  ;;  %v462_v7 = vmul.f32 %v461_v15, %v1460_v2  ;;  %v779_v29 = vadd.f32 0.112945676, %v778_v32 }
 0x140   :  { %v707_v44 = vmul.f32 %v1069_v49, %v706_v46  ;;  %v861_v24 = vmul.f32 %v845_v4, %v1470_v53  ;;  %vm1809_vm6 = vcmp.eq.f32.partialorder %v713_v45, 8.507059e+37  ;;  %v496_v57 = vmul.f32 %v495_v23, %v1553_v39  ;;  %vm711_vm7 = vmor %vm709_vm4, %vm710_vm5 }
 0x141   :  { %v814_v5 = vmul.f32 3.8918573e-05, %v1616_v12  ;;  %v716_v33 = vor.u32 1.1754944e-38, %v715_v48  ;;  %v1815_v37 = vadd.f32 1.0, %v462_v7  ;;  %v780_v35 = vmul.f32 %v779_v29, %v1496_v43 }
 0x142   :  { %v1071_v28 = vpop.eup %1070  ;;  %v708_v25 = vadd.f32 %v1069_v49, %v707_v44  ;;  %921 = vmatmul.f32.gmra.mxu1 %v861_v24  ;;  %vm429_vm8 = vweird.f32 %v1780_v21  ;;  %v497_v53 = vadd.f32 0.014752088, %v496_v57  ;;  %v433_v9 = vand.u32 2147483647, %v1780_v21 }
 0x143   :  { %v425_v2 = vmul.f32 %v1071_v28, %v1780_v21  ;;  %v815_v54 = vadd.f32 0.001143296, %v814_v5  ;;  %v1073_v50 = vpop.eup %1072  ;;  %v435_v1 = vand.u32 2147483648, %v1780_v21  ;;  %1074 = vrcp.f32 %v1815_v37 }
 0x144   :  { %v712_v30 = vsel %vm711_vm7, %v1069_v49, %v708_v25  ;;  %v745_v10 = vmul.f32 %v1073_v50, %v1785_v16  ;;  %vm749_vm9 = vweird.f32 %v1785_v16  ;;  %vm430_vm10 = vweird.f32 %v1071_v28 }
 0x145   :  { %v717_v60 = vsel %vm1809_vm6, %v716_v33, %v712_v30  ;;  %v426_v14 = vsub.f32 1.0, %v425_v2  ;;  %v753_v22 = vand.u32 2147483647, %v1785_v16  ;;  %v781_v34 = vadd.f32 0.4994258, %v780_v35  ;;  %vm431_vm13 = vmor %vm429_vm8, %vm430_vm10 }
 0x146   :  { %v718_v55 = vmul.f32 %v717_v60, %v1575_v63  ;;  %v746_v20 = vsub.f32 1.0, %v745_v10  ;;  %v498_v17 = vmul.f32 %v497_v53, %v1553_v39  ;;  %v816_v51 = vmul.f32 %v815_v54, %v1616_v12 }
 0x147   :  { %v427_v61 = vmul.f32 %v1071_v28, %v426_v14  ;;  %vm1833_vm11 = vcmp.eq.f32.partialorder %v433_v9, 8.507059e+37  ;;  %v755_v36 = vand.u32 2147483648, %v1785_v16  ;;  %v782_v58 = vmul.f32 %v781_v34, %v1496_v43  ;;  %v1932_v43 = vld [vmem:[#allocation15_spill] sm:$0xff] }
 0x148   :  { %v1006_v40 = vclamps-f32 %v718_v55, 1.0  ;;  %v436_v42 = vor.u32 1.1754944e-38, %v435_v1  ;;  %v747_v47 = vmul.f32 %v1073_v50, %v746_v20  ;;  %vm750_vm12 = vweird.f32 %v1073_v50 }
 0x149   :  { %v428_v63 = vadd.f32 %v1071_v28, %v427_v61  ;;  %v1075_v19 = vpop.eup %1074  ;;  %v1842_v49 = vadd.f32 1.0, %v782_v58  ;;  %v499_v27 = vadd.f32 0.112945676, %v498_v17  ;;  %v817_v31 = vadd.f32 0.014752088, %v816_v51  ;;  %vm751_vm15 = vmor %vm749_vm9, %vm750_vm12 }
 0x14a   :  { %v853_v59 = vadd.f32 1.0, %v1006_v40  ;;  %v748_v11 = vadd.f32 %v1073_v50, %v747_v47  ;;  %vm754_vm14 = vcmp.eq.f32.partialorder %v753_v22, 8.507059e+37  ;;  %v465_v52 = vmul.f32 %v1075_v19, %v1815_v37 }
 0x14b   :  { %v432_v15 = vsel %vm431_vm13, %v1071_v28, %v428_v63  ;;  %v756_v45 = vor.u32 1.1754944e-38, %v755_v36  ;;  %1076 = vrcp.f32 %v1842_v49  ;;  %v473_v48 = vand.u32 2147483647, %v1815_v37 }
 0x14c   :  { %v869_v32 = vmul.f32 %v853_v59, %v1932_v43  ;;  %v437_v56 = vsel %vm1833_vm11, %v436_v42, %v432_v15  ;;  %v752_v23 = vsel %vm751_vm15, %v1073_v50, %v748_v11  ;;  %v466_v46 = vsub.f32 1.0, %v465_v52  ;;  %v1933_v50 = vld [vmem:[#allocation16_spill] sm:$0xff]  ;;  %v1935_v42 = vld [vmem:[#allocation14_spill] sm:$0xff] }
 0x14d   :  { %v438_v21 = vmul.f32 %v437_v56, %v1588_v3  ;;  %v757_v4 = vsel %vm754_vm14, %v756_v45, %v752_v23  ;;  %v475_v44 = vand.u32 2147483648, %v1815_v37  ;;  %v500_v7 = vmul.f32 %v499_v27, %v1553_v39 }
 0x14e   :  { %945 = vmatmul.f32.gmra.mxu3 %v869_v32  ;;  %v818_v29 = vmul.f32 %v817_v31, %v1616_v12  ;;  %v758_v16 = vmul.f32 %v757_v4, %v1591_v41  ;;  %v467_v6 = vmul.f32 %v1075_v19, %v466_v46  ;;  %vm470_vm0 = vweird.f32 %v1075_v19 }
 0x14f   :  { %v999_v24 = vclamps-f32 %v438_v21, 1.0  ;;  %v489_v3 = vmul.f32 %v1802_v26, %v1553_v39  ;;  %v807_v57 = vmul.f32 %v1804_v38, %v1616_v12  ;;  %v501_v5 = vadd.f32 0.4994258, %v500_v7 }
 0x150   :  { %v819_v28 = vadd.f32 0.112945676, %v818_v29  ;;  %v1007_v33 = vclamps-f32 %v758_v16, 1.0  ;;  %v468_v35 = vadd.f32 %v1075_v19, %v467_v6  ;;  %vm469_vm1 = vweird.f32 %v1815_v37 }
 0x151   :  { %v846_v25 = vadd.f32 1.0, %v999_v24  ;;  %v1077_v2 = vpop.eup %1076  ;;  %vm471_vm2 = vmor %vm469_vm1, %vm470_vm0  ;;  %vm474_vm3 = vcmp.eq.f32.partialorder %v473_v48, 8.507059e+37  ;;  %v476_v53 = vor.u32 1.1754944e-38, %v475_v44  ;;  %v502_v41 = vmul.f32 %v501_v5, %v1553_v39 }
 0x152   :  { %v820_v54 = vmul.f32 %v819_v28, %v1616_v12  ;;  %v854_v30 = vadd.f32 1.0, %v1007_v33  ;;  %v472_v9 = vsel %vm471_vm2, %v1075_v19, %v468_v35  ;;  %v785_v38 = vmul.f32 %v1077_v2, %v1842_v49 }
 0x153   :  { %v862_v26 = vmul.f32 %v846_v25, %v1933_v50  ;;  %v808_v1 = vadd.f32 0.05243302, %v807_v57  ;;  %v477_v60 = vsel %vm474_vm3, %v476_v53, %v472_v9  ;;  %v503_v14 = vadd.f32 1.0, %v502_v41  ;;  %v1937_v50 = vld [vmem:[#allocation19_spill] sm:$0xff] }
 0x154   :  { %v821_v10 = vadd.f32 0.4994258, %v820_v54  ;;  %v870_v37 = vmul.f32 %v854_v30, %v1521_v18  ;;  %v478_v55 = vmul.f32 %v477_v60, %v1793_v62  ;;  %v786_v22 = vsub.f32 1.0, %v785_v38  ;;  %v1938_v30 = vld [vmem:[#allocation17_spill] sm:$0xff] }
 0x155   :  { %924 = vmatmul.f32.gmra.mxu1 %v862_v26  ;;  %v772_v34 = vadd.f32 1.1283791, %v1798_v8  ;;  %v793_v61 = vand.u32 2147483647, %v1842_v49  ;;  %v795_v20 = vand.u32 2147483648, %v1842_v49  ;;  %1078 = vrcp.f32 %v503_v14 }
 0x156   :  { %948 = vmatmul.f32.gmra.mxu3 %v870_v37  ;;  %v1000_v17 = vclamps-f32 %v478_v55, 1.0  ;;  %v787_v51 = vmul.f32 %v1077_v2, %v786_v22  ;;  %vm790_vm4 = vweird.f32 %v1077_v2  ;;  %v822_v40 = vmul.f32 %v821_v10, %v1616_v12  ;;  %v1049_v37 = vld [vmem:[%s1896_s4] ss:$0 sm:$0xff]  ;;  %v1939_v55 = vld [vmem:[#allocation18_spill] sm:$0xff]  ;;  %s1189_s4 = smov [#allocation8]  }
 0x157   :  { %v175_v36 = vmul.f32 0.5, %v1934_v13  ;;  %v490_v58 = vadd.f32 0.18741608, %v489_v3  ;;  %v809_v18 = vmul.f32 %v808_v1, %v1616_v12  ;;  %vm789_vm5 = vweird.f32 %v1842_v49  ;;  %v1936_v49 = vld [vmem:[#allocation13_spill] sm:$0xff]  ;;  %s978_s10 = sshll.u32 %s1189_s4, 4  ;;  %s979_s10 = int_to_ptr.vmem [resolvable:$true] %s978_s10 }
 0x158   :  { %v847_v62 = vadd.f32 1.0, %v1000_v17  ;;  %v788_v63 = vadd.f32 %v1077_v2, %v787_v51  ;;  %v823_v8 = vadd.f32 1.0, %v822_v40  ;;  %v773_v47 = vmul.f32 %v772_v34, %v1935_v42  ;;  %vm791_vm6 = vmor %vm789_vm5, %vm790_vm4 }
 0x159   :  { %v796_v19 = vor.u32 1.1754944e-38, %v795_v20  ;;  %vm794_vm7 = vcmp.eq.f32.partialorder %v793_v61, 8.507059e+37  ;;  %v491_v15 = vmul.f32 %v490_v58, %v1553_v39  ;;  %v810_v11 = vadd.f32 0.18741608, %v809_v18 }
 0x15a   :  { %v863_v59 = vmul.f32 %v847_v62, %v175_v36  ;;  %v792_v27 = vsel %vm791_vm6, %v1077_v2, %v788_v63  ;;  %1080 = vrcp.f32 %v823_v8  ;;  %v183_v21 = vmul.f32 0.5, %v1936_v49 }
 0x15b   :  { %v1079_v31 = vpop.eup %1078  ;;  %v797_v52 = vsel %vm794_vm7, %v796_v19, %v792_v27  ;;  %v492_v23 = vadd.f32 1.1283791, %v491_v15  ;;  %v811_v46 = vmul.f32 %v810_v11, %v1616_v12  ;;  %v515_v48 = vand.u32 2147483648, %v503_v14 }
 0x15c   :  { %v798_v43 = vmul.f32 %v797_v52, %v773_v47  ;;  %v505_v32 = vmul.f32 %v1079_v31, %v503_v14  ;;  %vm510_vm8 = vweird.f32 %v1079_v31  ;;  %v513_v29 = vand.u32 2147483647, %v503_v14 }
 0x15d   :  { %927 = vmatmul.f32.gmra.mxu1 %v863_v59  ;;  %vm509_vm9 = vweird.f32 %v503_v14  ;;  %v493_v6 = vmul.f32 %v492_v23, %v1529_v0  ;;  %v516_v3 = vor.u32 1.1754944e-38, %v515_v48  ;;  %v812_v5 = vadd.f32 1.1283791, %v811_v46 }
 0x15e   :  { %v1008_v56 = vclamps-f32 %v798_v43, 1.0  ;;  %v506_v45 = vsub.f32 1.0, %v505_v32  ;;  %vm511_vm10 = vmor %vm509_vm9, %vm510_vm8  ;;  %vm514_vm11 = vcmp.eq.f32.partialorder %v513_v29, 8.507059e+37  ;;  %v835_v12 = vand.u32 2147483648, %v823_v8 }
 0x15f   :  { %v833_v35 = vand.u32 2147483647, %v823_v8  ;;  %vm829_vm13 = vweird.f32 %v823_v8  ;;  %v813_v0 = vmul.f32 %v812_v5, %v1937_v50  ;;  %v176_v9 = vmul.f32 0.5, %v1938_v30 }
 0x160   :  { %v1081_v4 = vpop.eup %1080  ;;  %v855_v44 = vadd.f32 1.0, %v1008_v56  ;;  %v507_v7 = vmul.f32 %v1079_v31, %v506_v45  ;;  %v836_v54 = vor.u32 1.1754944e-38, %v835_v12  ;;  %v184_v22 = vmul.f32 0.5, %v1939_v55 }
 0x161   :  { %v825_v24 = vmul.f32 %v1081_v4, %v823_v8  ;;  %vm830_vm12 = vweird.f32 %v1081_v4  ;;  %vm834_vm15 = vcmp.eq.f32.partialorder %v833_v35, 8.507059e+37 }
 0x162   :  { %v871_v39 = vmul.f32 %v855_v44, %v183_v21  ;;  %v508_v16 = vadd.f32 %v1079_v31, %v507_v7  ;;  %vm831_vm14 = vmor %vm829_vm13, %vm830_vm12 }
 0x163   :  { %v826_v57 = vsub.f32 1.0, %v825_v24 }
 0x164   :  { %951 = vmatmul.f32.gmra.mxu3 %v871_v39  ;;  %v512_v28 = vsel %vm511_vm10, %v1079_v31, %v508_v16 }
 0x165   :  { %v517_v25 = vsel %vm514_vm11, %v516_v3, %v512_v28  ;;  %v827_v33 = vmul.f32 %v1081_v4, %v826_v57 }
 0x166   :  { %v518_v2 = vmul.f32 %v517_v25, %v493_v6 }
 0x167   :  { %v828_v53 = vadd.f32 %v1081_v4, %v827_v33 }
 0x168   :  { %v1001_v41 = vclamps-f32 %v518_v2, 1.0 }
 0x169   :  { %v832_v26 = vsel %vm831_vm14, %v1081_v4, %v828_v53 }
 0x16a   :  { %v848_v38 = vadd.f32 1.0, %v1001_v41  ;;  %v837_v1 = vsel %vm834_vm15, %v836_v54, %v832_v26 }
 0x16b   :  { %v838_v60 = vmul.f32 %v837_v1, %v813_v0 }
 0x16c   :  { %v864_v14 = vmul.f32 %v848_v38, %v176_v9 }
 0x16d   :  { %v1009_v10 = vclamps-f32 %v838_v60, 1.0 }
 0x16e   :  { %930 = vmatmul.f32.gmra.mxu1 %v864_v14 }
 0x16f   :  { %v856_v34 = vadd.f32 1.0, %v1009_v10 }
 0x171   :  { %v910_v61 = vpop.f32.mrf.mxu1  ;;  %v872_v20 = vmul.f32 %v856_v34, %v184_v22 }
 0x172   :  { %v911_v17 = vadd.f32 %v1049_v37, %v910_v61 }
 0x173   :  { %954 = vmatmul.f32.gmra.mxu3 %v872_v20 }
 0x174   :  { %958 = vst [vmem:[#allocation8] sm:$0xff] %v911_v17 }
 0x197   :  { %v934_v51 = vpop.f32.mrf.mxu3 }
 0x198   :  { %v935_v40 = vadd.f32 %v1049_v37, %v934_v51 }
 0x19a   :  { %966 = vst [vmem:[#allocation8 + $0x40] sm:$0xff] %v935_v40 }
 0x19b   :  { %v913_v13 = vpop.f32.mrf.mxu1 }
 0x19c   :  { %v914_v36 = vadd.f32 %v1049_v37, %v913_v13 }
 0x19e   :  { %959 = vst [vmem:[#allocation8 + $0x8] sm:$0xff] %v914_v36 }
 0x1a3   :  { %v916_v58 = vpop.f32.mrf.mxu1 }
 0x1a4   :  { %v917_v18 = vadd.f32 %v1049_v37, %v916_v58 }
 0x1a5   :  { %v937_v62 = vpop.f32.mrf.mxu3 }
 0x1a6   :  { %960 = vst [vmem:[#allocation8 + $0x10] sm:$0xff] %v917_v18  ;;  %v938_v63 = vadd.f32 %v1049_v37, %v937_v62 }
 0x1a8   :  { %967 = vst [vmem:[#allocation8 + $0x48] sm:$0xff] %v938_v63 }
 0x1b1   :  { %v940_v8 = vpop.f32.mrf.mxu3 }
 0x1b2   :  { %v941_v42 = vadd.f32 %v1049_v37, %v940_v8  ;;  %v919_v47 = vpop.f32.mrf.mxu1 }
 0x1b3   :  { %v920_v19 = vadd.f32 %v1049_v37, %v919_v47 }
 0x1b4   :  { %968 = vst [vmem:[#allocation8 + $0x50] sm:$0xff] %v941_v42 }
 0x1b5   :  { %961 = vst [vmem:[#allocation8 + $0x18] sm:$0xff] %v920_v19 }
 0x1bf   :  { %v922_v59 = vpop.f32.mrf.mxu1 }
 0x1c0   :  { %v923_v27 = vadd.f32 %v1049_v37, %v922_v59  ;;  %v943_v31 = vpop.f32.mrf.mxu3 }
 0x1c1   :  { %v944_v15 = vadd.f32 %v1049_v37, %v943_v31 }
 0x1c2   :  { %962 = vst [vmem:[#allocation8 + $0x20] sm:$0xff] %v923_v27 }
 0x1c3   :  { %969 = vst [vmem:[#allocation8 + $0x58] sm:$0xff] %v944_v15 }
 0x1d1   :  { %v946_v11 = vpop.f32.mrf.mxu3 }
 0x1d2   :  { %v925_v52 = vpop.f32.mrf.mxu1  ;;  %v947_v43 = vadd.f32 %v1049_v37, %v946_v11 }
 0x1d3   :  { %v926_v32 = vadd.f32 %v1049_v37, %v925_v52 }
 0x1d4   :  { %970 = vst [vmem:[#allocation8 + $0x60] sm:$0xff] %v947_v43 }
 0x1d5   :  { %963 = vst [vmem:[#allocation8 + $0x28] sm:$0xff] %v926_v32 }
 0x1d9   :  { %v949_v45 = vpop.f32.mrf.mxu3 }
 0x1da   :  { %v928_v56 = vpop.f32.mrf.mxu1  ;;  %v950_v21 = vadd.f32 %v1049_v37, %v949_v45 }
 0x1db   :  { %v929_v49 = vadd.f32 %v1049_v37, %v928_v56 }
 0x1dc   :  { %971 = vst [vmem:[#allocation8 + $0x68] sm:$0xff] %v950_v21 }
 0x1dd   :  { %964 = vst [vmem:[#allocation8 + $0x30] sm:$0xff] %v929_v49 }
 0x1e7   :  { %v952_v23 = vpop.f32.mrf.mxu3 }
 0x1e8   :  { %v953_v46 = vadd.f32 %v1049_v37, %v952_v23 }
 0x1ea   :  { %972 = vst [vmem:[#allocation8 + $0x70] sm:$0xff] %v953_v46 }
 0x1eb   :  { %v931_v48 = vpop.f32.mrf.mxu1 }
 0x1ec   :  { %v932_v4 = vadd.f32 %v1049_v37, %v931_v48 }
 0x1ee   :  { %965 = vst [vmem:[#allocation8 + $0x38] sm:$0xff] %v932_v4 }
 0x1f6   :  { %v955_v44 = vpop.f32.mrf.mxu3 }
 0x1f7   :  { %v956_v7 = vadd.f32 %v1049_v37, %v955_v44 }
 0x1f9   :  { %973 = vst [vmem:[#allocation8 + $0x78] sm:$0xff] %v956_v7 }
 0x1fa   :  { %986 = dma.vmem_to_hbm [thread:$0]  %s979_s10, 2048, %s981_s13, [#allocation4], %s1185_s26, %s1185_s26, %s1186_s27  }
 0x1fb   :  { %1182 = dma.done.wait [#allocation4], 2048  }
 0x1fc   :  { %1183 = vsyncadd [#allocation4], 4294965248 }
 0x1fd   :  { %991 = vsyncpa [#allocation3], 1 }
 0x1fe   :  { %992 = vsyncpa [#allocation6], 1 }
 0x1ff   :  { %993 = vsyncpa [#allocation4], 1 }

</bundles_post_ra>
